<compile_context>
chip_gen: v5e
topology: v5e:2x2
jax: 0.10.0
libtpu: 0.0.40
codegen_flags: <defaults>
</compile_context>

<pallas_src>
import jax
import jax.numpy as jnp
from jax.experimental import pallas as pl
from jax.experimental.pallas import tpu as pltpu

EPS = 1e-5
# bf16 operands on the MXU (f32 accumulation).  Set to jnp.float32 for a
# bit-accurate match of the f32 reference (self-check tolerance adapts).
MXU_DTYPE = jnp.bfloat16


def _compiler_params(per_step_bytes):
    """Batch axis parallel + explicit scoped-VMEM limit sized from the tile."""
    # Default scoped limit is 16 MiB (v5e) / 32 MiB (v6e, v7x); 4x headroom
    # covers Pallas' double-buffering.  Capped at v7x's 64 MiB physical VMEM.
    limit = int(min(max(4 * per_step_bytes, 32 * 1024 * 1024), 64 * 1024 * 1024))
    return pltpu.CompilerParams(dimension_semantics=("parallel",),
                                vmem_limit_bytes=limit)


def _zero_scratch_border(xp_ref):
    """Zero only the 1-px padding border (interior is overwritten each step)."""
    Hp, Wp, c = xp_ref.shape
    zr = jnp.zeros((1, Wp, c), xp_ref.dtype)
    xp_ref[0:1, :, :] = zr
    xp_ref[Hp - 1:Hp, :, :] = zr
    zc = jnp.zeros((Hp, 1, c), xp_ref.dtype)
    xp_ref[:, 0:1, :] = zc
    xp_ref[:, Wp - 1:Wp, :] = zc


def _conv3x3_accum(xp_ref, w_ref, cb):
    """9 accumulated MXU dots over the padded scratch (no im2col slab)."""
    Hp, Wp, cin = xp_ref.shape
    Hh, Wh = Hp - 2, Wp - 2
    hw = Hh * Wh
    acc = cb  # f32 [hw, cout]: coord-channel conv + conv bias epilogue
    for ky in range(3):
        for kx in range(3):
            k = ky * 3 + kx
            patch = xp_ref[ky:ky + Hh, kx:kx + Wh, :].reshape(hw, cin)
            acc = acc + jnp.dot(patch.astype(w_ref.dtype), w_ref[k],
                                preferred_element_type=jnp.float32)
    return acc


def _emit_bn_partials(acc, hw, s_ref, q_ref):
    """Per-element sum + per-element-mean-centered sum of squares (stable)."""
    s = jnp.sum(acc, axis=0, keepdims=True)          # [1, C]
    d = acc - s * (1.0 / hw)
    s_ref[0] = s
    q_ref[0] = jnp.sum(d * d, axis=0, keepdims=True)


# -----------------------------------------------------------------------------
# Kernel 1: fused max-pool -> pad -> conv (+coord/bias) + BN partial stats.
# -----------------------------------------------------------------------------
def _pool_conv_stats_kernel(x_ref, w_ref, cb_ref, y_ref, s_ref, q_ref, xp_ref):
    # x_ref : [1, Hh, 2, Wh, 2*Cin]  pooling-window view of the NHWC input
    # w_ref : [9, Cin, C1] (MXU dtype) data-channel conv weights
    # cb_ref: [Hh*Wh, C1]            precomputed coord-channel conv + bias map
    # y_ref : [1, Hh*Wh, C1]         conv output (pre-BN)
    # s_ref, q_ref : [1, 1, C1]      BN partial statistics
    # xp_ref: [Hh+2, Wh+2, Cin]      VMEM scratch (zero-padded pooled tile)
    Hp, Wp, cin = xp_ref.shape
    Hh, Wh = Hp - 2, Wp - 2
    hw = Hh * Wh

    # 2x2 max-pool fused into the load path
    xwin = x_ref[0]                                         # [Hh, 2, Wh, 2*Cin]
    rm = jnp.maximum(xwin[:, 0, :, :], xwin[:, 1, :, :])    # [Hh, Wh, 2*Cin]
    pooled = jnp.maximum(rm[:, :, :cin], rm[:, :, cin:])    # [Hh, Wh, Cin]

    _zero_scratch_border(xp_ref)
    xp_ref[1:Hh + 1, 1:Wh + 1, :] = pooled

    acc = _conv3x3_accum(xp_ref, w_ref, cb_ref[...])        # [hw, C1] f32
    y_ref[0] = acc.astype(y_ref.dtype)
    _emit_bn_partials(acc, hw, s_ref, q_ref)


# -----------------------------------------------------------------------------
# Kernel 2: fused BN affine + ReLU (layer 1) -> pad -> conv2 (+coord/bias)
#           + BN partial stats for layer 2.
# -----------------------------------------------------------------------------
def _bnrelu_conv_stats_kernel(y_ref, sc_ref, sh_ref, w_ref, cb_ref,
                              o_ref, s_ref, q_ref, xp_ref):
    # y_ref : [1, Hh*Wh, C1];  sc_ref, sh_ref: [1, C1] folded BN scale/shift
    # w_ref : [9, C1, C2];  cb_ref: [Hh*Wh, C2]
    # o_ref : [1, Hh*Wh, C2];  s_ref, q_ref: [1, 1, C2]
    # xp_ref: [Hh+2, Wh+2, C1] VMEM scratch
    Hp, Wp, c1 = xp_ref.shape
    Hh, Wh = Hp - 2, Wp - 2
    hw = Hh * Wh

    z = jnp.maximum(y_ref[0] * sc_ref[...] + sh_ref[...], 0.0)   # [hw, C1]

    _zero_scratch_border(xp_ref)
    xp_ref[1:Hh + 1, 1:Wh + 1, :] = z.reshape(Hh, Wh, c1)

    acc = _conv3x3_accum(xp_ref, w_ref, cb_ref[...])             # [hw, C2] f32
    o_ref[0] = acc.astype(o_ref.dtype)
    _emit_bn_partials(acc, hw, s_ref, q_ref)


# -----------------------------------------------------------------------------
# Kernel 3: final BN affine + ReLU, written channel-first (fused transpose).
# -----------------------------------------------------------------------------
def _bnrelu_t_kernel(y_ref, sc_ref, sh_ref, o_ref):
    # y_ref: [1, hw, C];  o_ref: [1, C, hw]  (lane dim = hw -> lane-dense store)
    z = jnp.maximum(y_ref[0] * sc_ref[...] + sh_ref[...], 0.0)   # [hw, C]
    o_ref[0] = z.T.astype(o_ref.dtype)                           # [C, hw]


# -----------------------------------------------------------------------------
# pallas_call wrappers
# -----------------------------------------------------------------------------
def _call_pool_conv(x5, w, cb, Hh, Wh, cin, cout):
    N = x5.shape[0]
    hw = Hh * Wh
    per_step = (Hh * 2 * Wh * 2 * cin * 4          # pooled-window input tile
                + 9 * cin * cout * 2 + hw * cout * 4   # weights + cb map
                + hw * cout * 4 + 2 * cout * 4         # outputs
                + (Hh + 2) * (Wh + 2) * cin * 4)       # scratch
    return pl.pallas_call(
        _pool_conv_stats_kernel,
        out_shape=(jax.ShapeDtypeStruct((N, hw, cout), jnp.float32),
                   jax.ShapeDtypeStruct((N, 1, cout), jnp.float32),
                   jax.ShapeDtypeStruct((N, 1, cout), jnp.float32)),
        grid=(N,),
        in_specs=[
            pl.BlockSpec((1, Hh, 2, Wh, 2 * cin), lambda n: (n, 0, 0, 0, 0)),
            pl.BlockSpec((9, cin, cout), lambda n: (0, 0, 0)),
            pl.BlockSpec((hw, cout), lambda n: (0, 0)),
        ],
        out_specs=(
            pl.BlockSpec((1, hw, cout), lambda n: (n, 0, 0)),
            pl.BlockSpec((1, 1, cout), lambda n: (n, 0, 0)),
            pl.BlockSpec((1, 1, cout), lambda n: (n, 0, 0)),
        ),
        scratch_shapes=[pltpu.VMEM((Hh + 2, Wh + 2, cin), jnp.float32)],
        compiler_params=_compiler_params(per_step),
    )(x5, w, cb)


def _call_bnrelu_conv(y, scale, shift, w, cb, Hh, Wh, cmid, cout):
    N, hw, _ = y.shape
    per_step = (hw * cmid * 4 + 2 * cmid * 4
                + 9 * cmid * cout * 2 + hw * cout * 4
                + hw * cout * 4 + 2 * cout * 4
                + (Hh + 2) * (Wh + 2) * cmid * 4)
    return pl.pallas_call(
        _bnrelu_conv_stats_kernel,
        out_shape=(jax.ShapeDtypeStruct((N, hw, cout), jnp.float32),
                   jax.ShapeDtypeStruct((N, 1, cout), jnp.float32),
                   jax.ShapeDtypeStruct((N, 1, cout), jnp.float32)),
        grid=(N,),
        in_specs=[
            pl.BlockSpec((1, hw, cmid), lambda n: (n, 0, 0)),
            pl.BlockSpec((1, cmid), lambda n: (0, 0)),
            pl.BlockSpec((1, cmid), lambda n: (0, 0)),
            pl.BlockSpec((9, cmid, cout), lambda n: (0, 0, 0)),
            pl.BlockSpec((hw, cout), lambda n: (0, 0)),
        ],
        out_specs=(
            pl.BlockSpec((1, hw, cout), lambda n: (n, 0, 0)),
            pl.BlockSpec((1, 1, cout), lambda n: (n, 0, 0)),
            pl.BlockSpec((1, 1, cout), lambda n: (n, 0, 0)),
        ),
        scratch_shapes=[pltpu.VMEM((Hh + 2, Wh + 2, cmid), jnp.float32)],
        compiler_params=_compiler_params(per_step),
    )(y, scale, shift, w, cb)


def _call_bnrelu_t(y, scale, shift):
    N, hw, c = y.shape
    per_step = 2 * hw * c * 4 + 2 * c * 4
    return pl.pallas_call(
        _bnrelu_t_kernel,
        out_shape=jax.ShapeDtypeStruct((N, c, hw), jnp.float32),
        grid=(N,),
        in_specs=[
            pl.BlockSpec((1, hw, c), lambda n: (n, 0, 0)),
            pl.BlockSpec((1, c), lambda n: (0, 0)),
            pl.BlockSpec((1, c), lambda n: (0, 0)),
        ],
        out_specs=pl.BlockSpec((1, c, hw), lambda n: (n, 0, 0)),
        compiler_params=_compiler_params(per_step),
    )(y, scale, shift)


# -----------------------------------------------------------------------------
# CoordConv decomposition + BN folding helpers (tiny, parameter-sized XLA work)
# -----------------------------------------------------------------------------
def _coord_bias_map(Hp, Wp, w_hwio, b):
    """3x3 conv of the (zero-padded) xx/yy coordinate planes + conv bias.

    w_hwio: [3, 3, Cin+2, Cout]; channel -2 = xx (varies over width),
    channel -1 = yy (varies over height) — matches torch.cat([x, xx, yy], 1).
    Returns a [Hp*Wp, Cout] map added in the conv epilogue.
    """
    cout = w_hwio.shape[-1]
    wd = max(Wp - 1, 1)   # guard the 1-pixel-wide / -tall deep-level case
    hd = max(Hp - 1, 1)
    xx = (jnp.arange(Wp, dtype=jnp.float32) / wd) * 2.0 - 1.0
    yy = (jnp.arange(Hp, dtype=jnp.float32) / hd) * 2.0 - 1.0
    xx_pad = jnp.pad(jnp.broadcast_to(xx[None, :], (Hp, Wp)), ((1, 1), (1, 1)))
    yy_pad = jnp.pad(jnp.broadcast_to(yy[:, None], (Hp, Wp)), ((1, 1), (1, 1)))
    cb = jnp.zeros((Hp, Wp, cout), jnp.float32)
    for ky in range(3):
        for kx in range(3):
            cb = cb + xx_pad[ky:ky + Hp, kx:kx + Wp, None] * w_hwio[ky, kx, -2, :]
            cb = cb + yy_pad[ky:ky + Hp, kx:kx + Wp, None] * w_hwio[ky, kx, -1, :]
    return (cb + b[None, None, :]).reshape(Hp * Wp, cout)


def _bn_fold(psum, pcssq, gamma, beta, per_elem, eps=EPS):
    """Combine per-element (sum, centered-SSQ) partials into BN scale/shift.

    Uses the pooled-variance (Chan) formula instead of E[x^2]-E[x]^2, avoiding
    catastrophic cancellation when |mean| >> std.
    """
    n = psum.shape[0]
    total = n * per_elem
    s = psum[:, 0, :]                                  # [N, C]
    mean_e = s / per_elem
    mean = jnp.sum(s, axis=0) / total                  # [C]
    var = (jnp.sum(pcssq[:, 0, :], axis=0)
           + per_elem * jnp.sum((mean_e - mean) ** 2, axis=0)) / total
    scale = gamma * jax.lax.rsqrt(var + eps)
    shift = beta - mean * scale
    return scale[None, :], shift[None, :]


# -----------------------------------------------------------------------------
# Down forward
# -----------------------------------------------------------------------------
def down_forward(x_nchw, params):
    N, cin, H, W = x_nchw.shape
    Hh, Wh = H // 2, W // 2                         # MaxPool2d(2) floors
    hw = Hh * Wh
    c1 = params["w1"].shape[-1]
    c2 = params["w2"].shape[-1]

    # NCHW -> NHWC (one XLA pass over the input), then expose the 2x2 pooling
    # windows with a free, contiguity-preserving reshape.
    x = jnp.transpose(x_nchw, (0, 2, 3, 1))[:, :2 * Hh, :2 * Wh, :]
    x5 = x.reshape(N, Hh, 2, Wh, 2 * cin)

    # CoordConv: data-channel weights feed the in-kernel MXU contraction (bf16);
    # the input-independent coordinate-channel conv + bias folds into a map.
    w1 = params["w1"][:, :, :cin, :].reshape(9, cin, c1).astype(MXU_DTYPE)
    cb1 = _coord_bias_map(Hh, Wh, params["w1"], params["b1"])
    w2 = params["w2"][:, :, :c1, :].reshape(9, c1, c2).astype(MXU_DTYPE)
    cb2 = _coord_bias_map(Hh, Wh, params["w2"], params["b2"])

    # layer 1: pool + conv + BN partial stats
    y1, s1, q1 = _call_pool_conv(x5, w1, cb1, Hh, Wh, cin, c1)
    sc1, sh1 = _bn_fold(s1, q1, params["gamma1"], params["beta1"], hw)

    # layer 2: BN+ReLU(layer 1) + conv + BN partial stats
    y2, s2, q2 = _call_bnrelu_conv(y1, sc1, sh1, w2, cb2, Hh, Wh, c1, c2)
    sc2, sh2 = _bn_fold(s2, q2, params["gamma2"], params["beta2"], hw)

    # final BN + ReLU, emitted channel-first -> only a free reshape to NCHW
    out = _call_bnrelu_t(y2, sc2, sh2)              # [N, C2, Hh*Wh]
    return out.reshape(N, c2, Hh, Wh)
    # TODO(synk): running_mean/running_var buffer updates of nn.BatchNorm2d
    # (a training-time side effect) are not reproduced; forward output only.


def init_params(key, in_channels, out_channels):
    mid = out_channels
    ks = jax.random.split(key, 8)
    return {
        "w1": 0.1 * jax.random.normal(ks[0], (3, 3, in_channels + 2, mid), jnp.float32),
        "b1": 0.1 * jax.random.normal(ks[1], (mid,), jnp.float32),
        "gamma1": 1.0 + 0.1 * jax.random.normal(ks[2], (mid,), jnp.float32),
        "beta1": 0.1 * jax.random.normal(ks[3], (mid,), jnp.float32),
        "w2": 0.1 * jax.random.normal(ks[4], (3, 3, mid + 2, out_channels), jnp.float32),
        "b2": 0.1 * jax.random.normal(ks[5], (out_channels,), jnp.float32),
        "gamma2": 1.0 + 0.1 * jax.random.normal(ks[6], (out_channels,), jnp.float32),
        "beta2": 0.1 * jax.random.normal(ks[7], (out_channels,), jnp.float32),
    }


# -----------------------------------------------------------------------------
# Pure-JAX reference (mirrors the PyTorch module) for a numerical self-check.
# -----------------------------------------------------------------------------
def _reference_down(x_nchw, params):
    N, cin, H, W = x_nchw.shape
    Hh, Wh = H // 2, W // 2
    x = jnp.transpose(x_nchw, (0, 2, 3, 1))[:, :2 * Hh, :2 * Wh, :]
    x = jnp.max(x.reshape(N, Hh, 2, Wh, 2, cin), axis=(2, 4))

    def coord_conv_bn_relu(z, w, b, gamma, beta):
        n, h, wd, _ = z.shape
        xx = (jnp.arange(wd, dtype=jnp.float32) / (wd - 1)) * 2.0 - 1.0
        yy = (jnp.arange(h, dtype=jnp.float32) / (h - 1)) * 2.0 - 1.0
        xx_ch = jnp.broadcast_to(xx[None, None, :, None], (n, h, wd, 1))
        yy_ch = jnp.broadcast_to(yy[None, :, None, None], (n, h, wd, 1))
        z = jnp.concatenate([z, xx_ch, yy_ch], axis=-1)
        y = jax.lax.conv_general_dilated(
            z, w, window_strides=(1, 1), padding="SAME",
            dimension_numbers=("NHWC", "HWIO", "NHWC"),
            precision=jax.lax.Precision.HIGHEST) + b
        mean = jnp.mean(y, axis=(0, 1, 2))
        var = jnp.mean((y - mean) ** 2, axis=(0, 1, 2))
        y = (y - mean) * jax.lax.rsqrt(var + EPS) * gamma + beta
        return jnp.maximum(y, 0.0)

    x = coord_conv_bn_relu(x, params["w1"], params["b1"],
                           params["gamma1"], params["beta1"])
    x = coord_conv_bn_relu(x, params["w2"], params["b2"],
                           params["gamma2"], params["beta2"])
    return jnp.transpose(x, (0, 3, 1, 2))


if __name__ == "__main__":
    key = jax.random.PRNGKey(0)
    kx, kp = jax.random.split(key)
    in_channels, out_channels = 4, 8
    N, H, W = 2, 16, 16
    x = jax.random.normal(kx, (N, in_channels, H, W), jnp.float32)   # NCHW
    params = init_params(kp, in_channels, out_channels)

    fwd = jax.jit(down_forward)
    out = jax.block_until_ready(fwd(x, params))
    assert out.shape == (N, out_channels, H // 2, W // 2), out.shape
    assert bool(jnp.all(jnp.isfinite(out)))

    ref = jax.block_until_ready(jax.jit(_reference_down)(x, params))
    # Tolerance budget: bf16 MXU operands (f32 accumulation) vs. an f32
    # HIGHEST-precision reference through two conv+BN layers.
    tol = 4e-2 if MXU_DTYPE == jnp.bfloat16 else 2e-3
    assert jnp.allclose(out, ref, atol=tol, rtol=tol), \
        float(jnp.max(jnp.abs(out - ref)))

    print("KERNEL_OK")
</pallas_src>

<mosaic_0001>
module attributes {stable_mosaic.version = 11 : i64} {
  func.func @_pool_conv_stats_kernel(%arg0: i32, %arg1: memref<1x8x2x8x8xf32, #tpu.memory_space<vmem>>, %arg2: memref<9x4x8xbf16, #tpu.memory_space<vmem>>, %arg3: memref<64x8xf32, #tpu.memory_space<vmem>>, %arg4: memref<1x64x8xf32, #tpu.memory_space<vmem>>, %arg5: memref<1x1x8xf32, #tpu.memory_space<vmem>>, %arg6: memref<1x1x8xf32, #tpu.memory_space<vmem>>, %arg7: memref<10x10x4xf32, #tpu.memory_space<vmem>>) attributes {dimension_semantics = [#tpu.dimension_semantics<parallel>], iteration_bounds = array<i64: 2>, scalar_prefetch = 0 : i64, scratch_operands = 1 : i64, tpu.core_type = #tpu.core_type<tc>, window_params = [{transform_indices = @transform_0, window_bounds = array<i64: 1, 8, 2, 8, 8>}, {pipeline_mode = #tpu.pipeline_mode<synchronous>, transform_indices = @transform_1, window_bounds = array<i64: 9, 4, 8>}, {pipeline_mode = #tpu.pipeline_mode<synchronous>, transform_indices = @transform_2, window_bounds = array<i64: 64, 8>}, {transform_indices = @transform_3, window_bounds = array<i64: 1, 64, 8>}, {transform_indices = @transform_4, window_bounds = array<i64: 1, 1, 8>}, {transform_indices = @transform_5, window_bounds = array<i64: 1, 1, 8>}]} {
    %c0 = arith.constant 0 : index
    %c0_0 = arith.constant 0 : index
    %c0_1 = arith.constant 0 : index
    %c0_2 = arith.constant 0 : index
    %c0_3 = arith.constant 0 : index
    %0 = vector.load %arg1[%c0, %c0_0, %c0_1, %c0_2, %c0_3] : memref<1x8x2x8x8xf32, #tpu.memory_space<vmem>>, vector<1x8x2x8x8xf32>
    %1 = vector.shape_cast %0 : vector<1x8x2x8x8xf32> to vector<8x2x8x8xf32>
    %2 = vector.extract_strided_slice %1 {offsets = [0, 0, 0, 0], sizes = [8, 1, 8, 8], strides = [1, 1, 1, 1]} : vector<8x2x8x8xf32> to vector<8x1x8x8xf32>
    %3 = vector.shape_cast %2 : vector<8x1x8x8xf32> to vector<8x8x8xf32>
    %4 = vector.extract_strided_slice %1 {offsets = [0, 1, 0, 0], sizes = [8, 1, 8, 8], strides = [1, 1, 1, 1]} : vector<8x2x8x8xf32> to vector<8x1x8x8xf32>
    %5 = vector.shape_cast %4 : vector<8x1x8x8xf32> to vector<8x8x8xf32>
    %6 = arith.maximumf %3, %5 : vector<8x8x8xf32>
    %7 = vector.extract_strided_slice %6 {offsets = [0, 0, 0], sizes = [8, 8, 4], strides = [1, 1, 1]} : vector<8x8x8xf32> to vector<8x8x4xf32>
    %8 = vector.extract_strided_slice %6 {offsets = [0, 0, 4], sizes = [8, 8, 4], strides = [1, 1, 1]} : vector<8x8x8xf32> to vector<8x8x4xf32>
    %9 = arith.maximumf %7, %8 : vector<8x8x4xf32>
    %cst = arith.constant 0.000000e+00 : f32
    %10 = vector.broadcast %cst : f32 to vector<1x10x4xf32>
    %c0_4 = arith.constant 0 : index
    %c0_5 = arith.constant 0 : index
    %c0_6 = arith.constant 0 : index
    %11 = vector.load %arg7[%c0_4, %c0_5, %c0_6] : memref<10x10x4xf32, #tpu.memory_space<vmem>>, vector<1x10x4xf32>
    tpu.vector_store %arg7[%c0_4, %c0_5, %c0_6], %10 {strides = array<i32>} : memref<10x10x4xf32, #tpu.memory_space<vmem>>, vector<1x10x4xf32>,
    %c9 = arith.constant 9 : index
    %c0_7 = arith.constant 0 : index
    %c0_8 = arith.constant 0 : index
    %12 = vector.load %arg7[%c9, %c0_7, %c0_8] : memref<10x10x4xf32, #tpu.memory_space<vmem>>, vector<1x10x4xf32>
    tpu.vector_store %arg7[%c9, %c0_7, %c0_8], %10 {strides = array<i32>} : memref<10x10x4xf32, #tpu.memory_space<vmem>>, vector<1x10x4xf32>,
    %cst_9 = arith.constant 0.000000e+00 : f32
    %13 = vector.broadcast %cst_9 : f32 to vector<10x1x4xf32>
    %c0_10 = arith.constant 0 : index
    %c0_11 = arith.constant 0 : index
    %c0_12 = arith.constant 0 : index
    %14 = vector.load %arg7[%c0_10, %c0_11, %c0_12] : memref<10x10x4xf32, #tpu.memory_space<vmem>>, vector<10x1x4xf32>
    tpu.vector_store %arg7[%c0_10, %c0_11, %c0_12], %13 {strides = array<i32>} : memref<10x10x4xf32, #tpu.memory_space<vmem>>, vector<10x1x4xf32>,
    %c0_13 = arith.constant 0 : index
    %c9_14 = arith.constant 9 : index
    %c0_15 = arith.constant 0 : index
    %15 = vector.load %arg7[%c0_13, %c9_14, %c0_15] : memref<10x10x4xf32, #tpu.memory_space<vmem>>, vector<10x1x4xf32>
    tpu.vector_store %arg7[%c0_13, %c9_14, %c0_15], %13 {strides = array<i32>} : memref<10x10x4xf32, #tpu.memory_space<vmem>>, vector<10x1x4xf32>,
    %c1 = arith.constant 1 : index
    %c1_16 = arith.constant 1 : index
    %c0_17 = arith.constant 0 : index
    %16 = vector.load %arg7[%c1, %c1_16, %c0_17] : memref<10x10x4xf32, #tpu.memory_space<vmem>>, vector<8x8x4xf32>
    tpu.vector_store %arg7[%c1, %c1_16, %c0_17], %9 {strides = array<i32>} : memref<10x10x4xf32, #tpu.memory_space<vmem>>, vector<8x8x4xf32>,
    %c0_18 = arith.constant 0 : index
    %c0_19 = arith.constant 0 : index
    %17 = vector.load %arg3[%c0_18, %c0_19] : memref<64x8xf32, #tpu.memory_space<vmem>>, vector<64x8xf32>
    %c0_20 = arith.constant 0 : index
    %c0_21 = arith.constant 0 : index
    %c0_22 = arith.constant 0 : index
    %18 = vector.load %arg7[%c0_20, %c0_21, %c0_22] : memref<10x10x4xf32, #tpu.memory_space<vmem>>, vector<8x8x4xf32>
    %19 = vector.shape_cast %18 : vector<8x8x4xf32> to vector<64x4xf32>
    %20 = arith.truncf %19 : vector<64x4xf32> to vector<64x4xbf16>
    %c0_23 = arith.constant 0 : index
    %c0_24 = arith.constant 0 : index
    %c0_25 = arith.constant 0 : index
    %21 = vector.load %arg2[%c0_23, %c0_24, %c0_25] : memref<9x4x8xbf16, #tpu.memory_space<vmem>>, vector<1x4x8xbf16>
    %22 = vector.shape_cast %21 : vector<1x4x8xbf16> to vector<4x8xbf16>
    %cst_26 = arith.constant dense<0.000000e+00> : vector<64x8xf32>
    %23 = tpu.matmul %20, %22, %cst_26 {dimension_numbers = #tpu.dot_dimension_numbers<[1], [0], [0], [1], [0, 0, 1, 1], [], []>} : vector<64x4xbf16>, vector<4x8xbf16>, vector<64x8xf32> -> vector<64x8xf32>
    %24 = arith.addf %17, %23 : vector<64x8xf32>
    %c0_27 = arith.constant 0 : index
    %c1_28 = arith.constant 1 : index
    %c0_29 = arith.constant 0 : index
    %25 = vector.load %arg7[%c0_27, %c1_28, %c0_29] : memref<10x10x4xf32, #tpu.memory_space<vmem>>, vector<8x8x4xf32>
    %26 = vector.shape_cast %25 : vector<8x8x4xf32> to vector<64x4xf32>
    %27 = arith.truncf %26 : vector<64x4xf32> to vector<64x4xbf16>
    %c1_30 = arith.constant 1 : index
    %c0_31 = arith.constant 0 : index
    %c0_32 = arith.constant 0 : index
    %28 = vector.load %arg2[%c1_30, %c0_31, %c0_32] : memref<9x4x8xbf16, #tpu.memory_space<vmem>>, vector<1x4x8xbf16>
    %29 = vector.shape_cast %28 : vector<1x4x8xbf16> to vector<4x8xbf16>
    %cst_33 = arith.constant dense<0.000000e+00> : vector<64x8xf32>
    %30 = tpu.matmul %27, %29, %cst_33 {dimension_numbers = #tpu.dot_dimension_numbers<[1], [0], [0], [1], [0, 0, 1, 1], [], []>} : vector<64x4xbf16>, vector<4x8xbf16>, vector<64x8xf32> -> vector<64x8xf32>
    %31 = arith.addf %24, %30 : vector<64x8xf32>
    %c0_34 = arith.constant 0 : index
    %c2 = arith.constant 2 : index
    %c0_35 = arith.constant 0 : index
    %32 = vector.load %arg7[%c0_34, %c2, %c0_35] : memref<10x10x4xf32, #tpu.memory_space<vmem>>, vector<8x8x4xf32>
    %33 = vector.shape_cast %32 : vector<8x8x4xf32> to vector<64x4xf32>
    %34 = arith.truncf %33 : vector<64x4xf32> to vector<64x4xbf16>
    %c2_36 = arith.constant 2 : index
    %c0_37 = arith.constant 0 : index
    %c0_38 = arith.constant 0 : index
    %35 = vector.load %arg2[%c2_36, %c0_37, %c0_38] : memref<9x4x8xbf16, #tpu.memory_space<vmem>>, vector<1x4x8xbf16>
    %36 = vector.shape_cast %35 : vector<1x4x8xbf16> to vector<4x8xbf16>
    %cst_39 = arith.constant dense<0.000000e+00> : vector<64x8xf32>
    %37 = tpu.matmul %34, %36, %cst_39 {dimension_numbers = #tpu.dot_dimension_numbers<[1], [0], [0], [1], [0, 0, 1, 1], [], []>} : vector<64x4xbf16>, vector<4x8xbf16>, vector<64x8xf32> -> vector<64x8xf32>
    %38 = arith.addf %31, %37 : vector<64x8xf32>
    %c1_40 = arith.constant 1 : index
    %c0_41 = arith.constant 0 : index
    %c0_42 = arith.constant 0 : index
    %39 = vector.load %arg7[%c1_40, %c0_41, %c0_42] : memref<10x10x4xf32, #tpu.memory_space<vmem>>, vector<8x8x4xf32>
    %40 = vector.shape_cast %39 : vector<8x8x4xf32> to vector<64x4xf32>
    %41 = arith.truncf %40 : vector<64x4xf32> to vector<64x4xbf16>
    %c3 = arith.constant 3 : index
    %c0_43 = arith.constant 0 : index
    %c0_44 = arith.constant 0 : index
    %42 = vector.load %arg2[%c3, %c0_43, %c0_44] : memref<9x4x8xbf16, #tpu.memory_space<vmem>>, vector<1x4x8xbf16>
    %43 = vector.shape_cast %42 : vector<1x4x8xbf16> to vector<4x8xbf16>
    %cst_45 = arith.constant dense<0.000000e+00> : vector<64x8xf32>
    %44 = tpu.matmul %41, %43, %cst_45 {dimension_numbers = #tpu.dot_dimension_numbers<[1], [0], [0], [1], [0, 0, 1, 1], [], []>} : vector<64x4xbf16>, vector<4x8xbf16>, vector<64x8xf32> -> vector<64x8xf32>
    %45 = arith.addf %38, %44 : vector<64x8xf32>
    %c1_46 = arith.constant 1 : index
    %c1_47 = arith.constant 1 : index
    %c0_48 = arith.constant 0 : index
    %46 = vector.load %arg7[%c1_46, %c1_47, %c0_48] : memref<10x10x4xf32, #tpu.memory_space<vmem>>, vector<8x8x4xf32>
    %47 = vector.shape_cast %46 : vector<8x8x4xf32> to vector<64x4xf32>
    %48 = arith.truncf %47 : vector<64x4xf32> to vector<64x4xbf16>
    %c4 = arith.constant 4 : index
    %c0_49 = arith.constant 0 : index
    %c0_50 = arith.constant 0 : index
    %49 = vector.load %arg2[%c4, %c0_49, %c0_50] : memref<9x4x8xbf16, #tpu.memory_space<vmem>>, vector<1x4x8xbf16>
    %50 = vector.shape_cast %49 : vector<1x4x8xbf16> to vector<4x8xbf16>
    %cst_51 = arith.constant dense<0.000000e+00> : vector<64x8xf32>
    %51 = tpu.matmul %48, %50, %cst_51 {dimension_numbers = #tpu.dot_dimension_numbers<[1], [0], [0], [1], [0, 0, 1, 1], [], []>} : vector<64x4xbf16>, vector<4x8xbf16>, vector<64x8xf32> -> vector<64x8xf32>
    %52 = arith.addf %45, %51 : vector<64x8xf32>
    %c1_52 = arith.constant 1 : index
    %c2_53 = arith.constant 2 : index
    %c0_54 = arith.constant 0 : index
    %53 = vector.load %arg7[%c1_52, %c2_53, %c0_54] : memref<10x10x4xf32, #tpu.memory_space<vmem>>, vector<8x8x4xf32>
    %54 = vector.shape_cast %53 : vector<8x8x4xf32> to vector<64x4xf32>
    %55 = arith.truncf %54 : vector<64x4xf32> to vector<64x4xbf16>
    %c5 = arith.constant 5 : index
    %c0_55 = arith.constant 0 : index
    %c0_56 = arith.constant 0 : index
    %56 = vector.load %arg2[%c5, %c0_55, %c0_56] : memref<9x4x8xbf16, #tpu.memory_space<vmem>>, vector<1x4x8xbf16>
    %57 = vector.shape_cast %56 : vector<1x4x8xbf16> to vector<4x8xbf16>
    %cst_57 = arith.constant dense<0.000000e+00> : vector<64x8xf32>
    %58 = tpu.matmul %55, %57, %cst_57 {dimension_numbers = #tpu.dot_dimension_numbers<[1], [0], [0], [1], [0, 0, 1, 1], [], []>} : vector<64x4xbf16>, vector<4x8xbf16>, vector<64x8xf32> -> vector<64x8xf32>
    %59 = arith.addf %52, %58 : vector<64x8xf32>
    %c2_58 = arith.constant 2 : index
    %c0_59 = arith.constant 0 : index
    %c0_60 = arith.constant 0 : index
    %60 = vector.load %arg7[%c2_58, %c0_59, %c0_60] : memref<10x10x4xf32, #tpu.memory_space<vmem>>, vector<8x8x4xf32>
    %61 = vector.shape_cast %60 : vector<8x8x4xf32> to vector<64x4xf32>
    %62 = arith.truncf %61 : vector<64x4xf32> to vector<64x4xbf16>
    %c6 = arith.constant 6 : index
    %c0_61 = arith.constant 0 : index
    %c0_62 = arith.constant 0 : index
    %63 = vector.load %arg2[%c6, %c0_61, %c0_62] : memref<9x4x8xbf16, #tpu.memory_space<vmem>>, vector<1x4x8xbf16>
    %64 = vector.shape_cast %63 : vector<1x4x8xbf16> to vector<4x8xbf16>
    %cst_63 = arith.constant dense<0.000000e+00> : vector<64x8xf32>
    %65 = tpu.matmul %62, %64, %cst_63 {dimension_numbers = #tpu.dot_dimension_numbers<[1], [0], [0], [1], [0, 0, 1, 1], [], []>} : vector<64x4xbf16>, vector<4x8xbf16>, vector<64x8xf32> -> vector<64x8xf32>
    %66 = arith.addf %59, %65 : vector<64x8xf32>
    %c2_64 = arith.constant 2 : index
    %c1_65 = arith.constant 1 : index
    %c0_66 = arith.constant 0 : index
    %67 = vector.load %arg7[%c2_64, %c1_65, %c0_66] : memref<10x10x4xf32, #tpu.memory_space<vmem>>, vector<8x8x4xf32>
    %68 = vector.shape_cast %67 : vector<8x8x4xf32> to vector<64x4xf32>
    %69 = arith.truncf %68 : vector<64x4xf32> to vector<64x4xbf16>
    %c7 = arith.constant 7 : index
    %c0_67 = arith.constant 0 : index
    %c0_68 = arith.constant 0 : index
    %70 = vector.load %arg2[%c7, %c0_67, %c0_68] : memref<9x4x8xbf16, #tpu.memory_space<vmem>>, vector<1x4x8xbf16>
    %71 = vector.shape_cast %70 : vector<1x4x8xbf16> to vector<4x8xbf16>
    %cst_69 = arith.constant dense<0.000000e+00> : vector<64x8xf32>
    %72 = tpu.matmul %69, %71, %cst_69 {dimension_numbers = #tpu.dot_dimension_numbers<[1], [0], [0], [1], [0, 0, 1, 1], [], []>} : vector<64x4xbf16>, vector<4x8xbf16>, vector<64x8xf32> -> vector<64x8xf32>
    %73 = arith.addf %66, %72 : vector<64x8xf32>
    %c2_70 = arith.constant 2 : index
    %c2_71 = arith.constant 2 : index
    %c0_72 = arith.constant 0 : index
    %74 = vector.load %arg7[%c2_70, %c2_71, %c0_72] : memref<10x10x4xf32, #tpu.memory_space<vmem>>, vector<8x8x4xf32>
    %75 = vector.shape_cast %74 : vector<8x8x4xf32> to vector<64x4xf32>
    %76 = arith.truncf %75 : vector<64x4xf32> to vector<64x4xbf16>
    %c8 = arith.constant 8 : index
    %c0_73 = arith.constant 0 : index
    %c0_74 = arith.constant 0 : index
    %77 = vector.load %arg2[%c8, %c0_73, %c0_74] : memref<9x4x8xbf16, #tpu.memory_space<vmem>>, vector<1x4x8xbf16>
    %78 = vector.shape_cast %77 : vector<1x4x8xbf16> to vector<4x8xbf16>
    %cst_75 = arith.constant dense<0.000000e+00> : vector<64x8xf32>
    %79 = tpu.matmul %76, %78, %cst_75 {dimension_numbers = #tpu.dot_dimension_numbers<[1], [0], [0], [1], [0, 0, 1, 1], [], []>} : vector<64x4xbf16>, vector<4x8xbf16>, vector<64x8xf32> -> vector<64x8xf32>
    %80 = arith.addf %73, %79 : vector<64x8xf32>
    %c0_76 = arith.constant 0 : index
    %c0_77 = arith.constant 0 : index
    %c0_78 = arith.constant 0 : index
    %81 = vector.load %arg4[%c0_76, %c0_77, %c0_78] : memref<1x64x8xf32, #tpu.memory_space<vmem>>, vector<1x64x8xf32>
    %82 = vector.shape_cast %81 : vector<1x64x8xf32> to vector<64x8xf32>
    %83 = vector.shape_cast %80 : vector<64x8xf32> to vector<1x64x8xf32>
    tpu.vector_store %arg4[%c0_76, %c0_77, %c0_78], %83 {strides = array<i32>} : memref<1x64x8xf32, #tpu.memory_space<vmem>>, vector<1x64x8xf32>,
    %cst_79 = arith.constant dense<0.000000e+00> : vector<8xf32>
    %84 = vector.multi_reduction <add>, %80, %cst_79 [0] : vector<64x8xf32> to vector<8xf32>
    %85 = vector.shape_cast %84 : vector<8xf32> to vector<1x8xf32>
    %cst_80 = arith.constant 1.562500e-02 : f32
    %86 = vector.broadcast %cst_80 : f32 to vector<1x8xf32>
    %87 = arith.mulf %85, %86 : vector<1x8xf32>
    %88 = vector.broadcast %87 : vector<1x8xf32> to vector<64x8xf32>
    %89 = arith.subf %80, %88 : vector<64x8xf32>
    %c0_81 = arith.constant 0 : index
    %c0_82 = arith.constant 0 : index
    %c0_83 = arith.constant 0 : index
    %90 = vector.load %arg5[%c0_81, %c0_82, %c0_83] : memref<1x1x8xf32, #tpu.memory_space<vmem>>, vector<1x1x8xf32>
    %91 = vector.shape_cast %90 : vector<1x1x8xf32> to vector<1x8xf32>
    %92 = vector.shape_cast %85 : vector<1x8xf32> to vector<1x1x8xf32>
    tpu.vector_store %arg5[%c0_81, %c0_82, %c0_83], %92 {strides = array<i32>} : memref<1x1x8xf32, #tpu.memory_space<vmem>>, vector<1x1x8xf32>,
    %93 = arith.mulf %89, %89 : vector<64x8xf32>
    %cst_84 = arith.constant dense<0.000000e+00> : vector<8xf32>
    %94 = vector.multi_reduction <add>, %93, %cst_84 [0] : vector<64x8xf32> to vector<8xf32>
    %95 = vector.shape_cast %94 : vector<8xf32> to vector<1x8xf32>
    %c0_85 = arith.constant 0 : index
    %c0_86 = arith.constant 0 : index
    %c0_87 = arith.constant 0 : index
    %96 = vector.load %arg6[%c0_85, %c0_86, %c0_87] : memref<1x1x8xf32, #tpu.memory_space<vmem>>, vector<1x1x8xf32>
    %97 = vector.shape_cast %96 : vector<1x1x8xf32> to vector<1x8xf32>
    %98 = vector.shape_cast %95 : vector<1x8xf32> to vector<1x1x8xf32>
    tpu.vector_store %arg6[%c0_85, %c0_86, %c0_87], %98 {strides = array<i32>} : memref<1x1x8xf32, #tpu.memory_space<vmem>>, vector<1x1x8xf32>,
    return
  }
  func.func @transform_0(%arg0: i32) -> (i32, i32, i32, i32, i32) {
    %c0_i32 = arith.constant 0 : i32
    %c0_i32_0 = arith.constant 0 : i32
    %c0_i32_1 = arith.constant 0 : i32
    %c0_i32_2 = arith.constant 0 : i32
    %c0_i32_3 = arith.constant 0 : i32
    return %arg0, %c0_i32, %c0_i32_0, %c0_i32_1, %c0_i32_2 : i32, i32, i32, i32, i32
  }
  func.func @transform_1(%arg0: i32) -> (i32, i32, i32) {
    %c0_i32 = arith.constant 0 : i32
    %c0_i32_0 = arith.constant 0 : i32
    %c0_i32_1 = arith.constant 0 : i32
    %c0_i32_2 = arith.constant 0 : i32
    return %c0_i32, %c0_i32_0, %c0_i32_1 : i32, i32, i32
  }
  func.func @transform_2(%arg0: i32) -> (i32, i32) {
    %c0_i32 = arith.constant 0 : i32
    %c0_i32_0 = arith.constant 0 : i32
    %c0_i32_1 = arith.constant 0 : i32
    return %c0_i32, %c0_i32_0 : i32, i32
  }
  func.func @transform_3(%arg0: i32) -> (i32, i32, i32) {
    %c0_i32 = arith.constant 0 : i32
    %c0_i32_0 = arith.constant 0 : i32
    %c0_i32_1 = arith.constant 0 : i32
    return %arg0, %c0_i32, %c0_i32_0 : i32, i32, i32
  }
  func.func @transform_4(%arg0: i32) -> (i32, i32, i32) {
    %c0_i32 = arith.constant 0 : i32
    %c0_i32_0 = arith.constant 0 : i32
    %c0_i32_1 = arith.constant 0 : i32
    return %arg0, %c0_i32, %c0_i32_0 : i32, i32, i32
  }
  func.func @transform_5(%arg0: i32) -> (i32, i32, i32) {
    %c0_i32 = arith.constant 0 : i32
    %c0_i32_0 = arith.constant 0 : i32
    %c0_i32_1 = arith.constant 0 : i32
    return %arg0, %c0_i32, %c0_i32_0 : i32, i32, i32
  }
}

module attributes {stable_mosaic.version = 11 : i64} {
  func.func @_bnrelu_conv_stats_kernel(%arg0: i32, %arg1: memref<1x64x8xf32, #tpu.memory_space<vmem>>, %arg2: memref<1x8xf32, #tpu.memory_space<vmem>>, %arg3: memref<1x8xf32, #tpu.memory_space<vmem>>, %arg4: memref<9x8x8xbf16, #tpu.memory_space<vmem>>, %arg5: memref<64x8xf32, #tpu.memory_space<vmem>>, %arg6: memref<1x64x8xf32, #tpu.memory_space<vmem>>, %arg7: memref<1x1x8xf32, #tpu.memory_space<vmem>>, %arg8: memref<1x1x8xf32, #tpu.memory_space<vmem>>, %arg9: memref<10x10x8xf32, #tpu.memory_space<vmem>>) attributes {dimension_semantics = [#tpu.dimension_semantics<parallel>], iteration_bounds = array<i64: 2>, scalar_prefetch = 0 : i64, scratch_operands = 1 : i64, tpu.core_type = #tpu.core_type<tc>, window_params = [{transform_indices = @transform_0, window_bounds = array<i64: 1, 64, 8>}, {pipeline_mode = #tpu.pipeline_mode<synchronous>, transform_indices = @transform_1, window_bounds = array<i64: 1, 8>}, {pipeline_mode = #tpu.pipeline_mode<synchronous>, transform_indices = @transform_2, window_bounds = array<i64: 1, 8>}, {pipeline_mode = #tpu.pipeline_mode<synchronous>, transform_indices = @transform_3, window_bounds = array<i64: 9, 8, 8>}, {pipeline_mode = #tpu.pipeline_mode<synchronous>, transform_indices = @transform_4, window_bounds = array<i64: 64, 8>}, {transform_indices = @transform_5, window_bounds = array<i64: 1, 64, 8>}, {transform_indices = @transform_6, window_bounds = array<i64: 1, 1, 8>}, {transform_indices = @transform_7, window_bounds = array<i64: 1, 1, 8>}]} {
    %c0 = arith.constant 0 : index
    %c0_0 = arith.constant 0 : index
    %c0_1 = arith.constant 0 : index
    %0 = vector.load %arg1[%c0, %c0_0, %c0_1] : memref<1x64x8xf32, #tpu.memory_space<vmem>>, vector<1x64x8xf32>
    %1 = vector.shape_cast %0 : vector<1x64x8xf32> to vector<64x8xf32>
    %c0_2 = arith.constant 0 : index
    %c0_3 = arith.constant 0 : index
    %2 = vector.load %arg2[%c0_2, %c0_3] : memref<1x8xf32, #tpu.memory_space<vmem>>, vector<1x8xf32>
    %3 = vector.broadcast %2 : vector<1x8xf32> to vector<64x8xf32>
    %4 = arith.mulf %1, %3 : vector<64x8xf32>
    %c0_4 = arith.constant 0 : index
    %c0_5 = arith.constant 0 : index
    %5 = vector.load %arg3[%c0_4, %c0_5] : memref<1x8xf32, #tpu.memory_space<vmem>>, vector<1x8xf32>
    %6 = vector.broadcast %5 : vector<1x8xf32> to vector<64x8xf32>
    %7 = arith.addf %4, %6 : vector<64x8xf32>
    %cst = arith.constant 0.000000e+00 : f32
    %8 = vector.broadcast %cst : f32 to vector<64x8xf32>
    %9 = arith.maximumf %7, %8 : vector<64x8xf32>
    %cst_6 = arith.constant 0.000000e+00 : f32
    %10 = vector.broadcast %cst_6 : f32 to vector<1x10x8xf32>
    %c0_7 = arith.constant 0 : index
    %c0_8 = arith.constant 0 : index
    %c0_9 = arith.constant 0 : index
    %11 = vector.load %arg9[%c0_7, %c0_8, %c0_9] : memref<10x10x8xf32, #tpu.memory_space<vmem>>, vector<1x10x8xf32>
    tpu.vector_store %arg9[%c0_7, %c0_8, %c0_9], %10 {strides = array<i32>} : memref<10x10x8xf32, #tpu.memory_space<vmem>>, vector<1x10x8xf32>,
    %c9 = arith.constant 9 : index
    %c0_10 = arith.constant 0 : index
    %c0_11 = arith.constant 0 : index
    %12 = vector.load %arg9[%c9, %c0_10, %c0_11] : memref<10x10x8xf32, #tpu.memory_space<vmem>>, vector<1x10x8xf32>
    tpu.vector_store %arg9[%c9, %c0_10, %c0_11], %10 {strides = array<i32>} : memref<10x10x8xf32, #tpu.memory_space<vmem>>, vector<1x10x8xf32>,
    %cst_12 = arith.constant 0.000000e+00 : f32
    %13 = vector.broadcast %cst_12 : f32 to vector<10x1x8xf32>
    %c0_13 = arith.constant 0 : index
    %c0_14 = arith.constant 0 : index
    %c0_15 = arith.constant 0 : index
    %14 = vector.load %arg9[%c0_13, %c0_14, %c0_15] : memref<10x10x8xf32, #tpu.memory_space<vmem>>, vector<10x1x8xf32>
    tpu.vector_store %arg9[%c0_13, %c0_14, %c0_15], %13 {strides = array<i32>} : memref<10x10x8xf32, #tpu.memory_space<vmem>>, vector<10x1x8xf32>,
    %c0_16 = arith.constant 0 : index
    %c9_17 = arith.constant 9 : index
    %c0_18 = arith.constant 0 : index
    %15 = vector.load %arg9[%c0_16, %c9_17, %c0_18] : memref<10x10x8xf32, #tpu.memory_space<vmem>>, vector<10x1x8xf32>
    tpu.vector_store %arg9[%c0_16, %c9_17, %c0_18], %13 {strides = array<i32>} : memref<10x10x8xf32, #tpu.memory_space<vmem>>, vector<10x1x8xf32>,
    %16 = vector.shape_cast %9 : vector<64x8xf32> to vector<8x8x8xf32>
    %c1 = arith.constant 1 : index
    %c1_19 = arith.constant 1 : index
    %c0_20 = arith.constant 0 : index
    %17 = vector.load %arg9[%c1, %c1_19, %c0_20] : memref<10x10x8xf32, #tpu.memory_space<vmem>>, vector<8x8x8xf32>
    tpu.vector_store %arg9[%c1, %c1_19, %c0_20], %16 {strides = array<i32>} : memref<10x10x8xf32, #tpu.memory_space<vmem>>, vector<8x8x8xf32>,
    %c0_21 = arith.constant 0 : index
    %c0_22 = arith.constant 0 : index
    %18 = vector.load %arg5[%c0_21, %c0_22] : memref<64x8xf32, #tpu.memory_space<vmem>>, vector<64x8xf32>
    %c0_23 = arith.constant 0 : index
    %c0_24 = arith.constant 0 : index
    %c0_25 = arith.constant 0 : index
    %19 = vector.load %arg9[%c0_23, %c0_24, %c0_25] : memref<10x10x8xf32, #tpu.memory_space<vmem>>, vector<8x8x8xf32>
    %20 = vector.shape_cast %19 : vector<8x8x8xf32> to vector<64x8xf32>
    %21 = arith.truncf %20 : vector<64x8xf32> to vector<64x8xbf16>
    %c0_26 = arith.constant 0 : index
    %c0_27 = arith.constant 0 : index
    %c0_28 = arith.constant 0 : index
    %22 = vector.load %arg4[%c0_26, %c0_27, %c0_28] : memref<9x8x8xbf16, #tpu.memory_space<vmem>>, vector<1x8x8xbf16>
    %23 = vector.shape_cast %22 : vector<1x8x8xbf16> to vector<8x8xbf16>
    %cst_29 = arith.constant dense<0.000000e+00> : vector<64x8xf32>
    %24 = tpu.matmul %21, %23, %cst_29 {dimension_numbers = #tpu.dot_dimension_numbers<[1], [0], [0], [1], [0, 0, 1, 1], [], []>} : vector<64x8xbf16>, vector<8x8xbf16>, vector<64x8xf32> -> vector<64x8xf32>
    %25 = arith.addf %18, %24 : vector<64x8xf32>
    %c0_30 = arith.constant 0 : index
    %c1_31 = arith.constant 1 : index
    %c0_32 = arith.constant 0 : index
    %26 = vector.load %arg9[%c0_30, %c1_31, %c0_32] : memref<10x10x8xf32, #tpu.memory_space<vmem>>, vector<8x8x8xf32>
    %27 = vector.shape_cast %26 : vector<8x8x8xf32> to vector<64x8xf32>
    %28 = arith.truncf %27 : vector<64x8xf32> to vector<64x8xbf16>
    %c1_33 = arith.constant 1 : index
    %c0_34 = arith.constant 0 : index
    %c0_35 = arith.constant 0 : index
    %29 = vector.load %arg4[%c1_33, %c0_34, %c0_35] : memref<9x8x8xbf16, #tpu.memory_space<vmem>>, vector<1x8x8xbf16>
    %30 = vector.shape_cast %29 : vector<1x8x8xbf16> to vector<8x8xbf16>
    %cst_36 = arith.constant dense<0.000000e+00> : vector<64x8xf32>
    %31 = tpu.matmul %28, %30, %cst_36 {dimension_numbers = #tpu.dot_dimension_numbers<[1], [0], [0], [1], [0, 0, 1, 1], [], []>} : vector<64x8xbf16>, vector<8x8xbf16>, vector<64x8xf32> -> vector<64x8xf32>
    %32 = arith.addf %25, %31 : vector<64x8xf32>
    %c0_37 = arith.constant 0 : index
    %c2 = arith.constant 2 : index
    %c0_38 = arith.constant 0 : index
    %33 = vector.load %arg9[%c0_37, %c2, %c0_38] : memref<10x10x8xf32, #tpu.memory_space<vmem>>, vector<8x8x8xf32>
    %34 = vector.shape_cast %33 : vector<8x8x8xf32> to vector<64x8xf32>
    %35 = arith.truncf %34 : vector<64x8xf32> to vector<64x8xbf16>
    %c2_39 = arith.constant 2 : index
    %c0_40 = arith.constant 0 : index
    %c0_41 = arith.constant 0 : index
    %36 = vector.load %arg4[%c2_39, %c0_40, %c0_41] : memref<9x8x8xbf16, #tpu.memory_space<vmem>>, vector<1x8x8xbf16>
    %37 = vector.shape_cast %36 : vector<1x8x8xbf16> to vector<8x8xbf16>
    %cst_42 = arith.constant dense<0.000000e+00> : vector<64x8xf32>
    %38 = tpu.matmul %35, %37, %cst_42 {dimension_numbers = #tpu.dot_dimension_numbers<[1], [0], [0], [1], [0, 0, 1, 1], [], []>} : vector<64x8xbf16>, vector<8x8xbf16>, vector<64x8xf32> -> vector<64x8xf32>
    %39 = arith.addf %32, %38 : vector<64x8xf32>
    %c1_43 = arith.constant 1 : index
    %c0_44 = arith.constant 0 : index
    %c0_45 = arith.constant 0 : index
    %40 = vector.load %arg9[%c1_43, %c0_44, %c0_45] : memref<10x10x8xf32, #tpu.memory_space<vmem>>, vector<8x8x8xf32>
    %41 = vector.shape_cast %40 : vector<8x8x8xf32> to vector<64x8xf32>
    %42 = arith.truncf %41 : vector<64x8xf32> to vector<64x8xbf16>
    %c3 = arith.constant 3 : index
    %c0_46 = arith.constant 0 : index
    %c0_47 = arith.constant 0 : index
    %43 = vector.load %arg4[%c3, %c0_46, %c0_47] : memref<9x8x8xbf16, #tpu.memory_space<vmem>>, vector<1x8x8xbf16>
    %44 = vector.shape_cast %43 : vector<1x8x8xbf16> to vector<8x8xbf16>
    %cst_48 = arith.constant dense<0.000000e+00> : vector<64x8xf32>
    %45 = tpu.matmul %42, %44, %cst_48 {dimension_numbers = #tpu.dot_dimension_numbers<[1], [0], [0], [1], [0, 0, 1, 1], [], []>} : vector<64x8xbf16>, vector<8x8xbf16>, vector<64x8xf32> -> vector<64x8xf32>
    %46 = arith.addf %39, %45 : vector<64x8xf32>
    %c1_49 = arith.constant 1 : index
    %c1_50 = arith.constant 1 : index
    %c0_51 = arith.constant 0 : index
    %47 = vector.load %arg9[%c1_49, %c1_50, %c0_51] : memref<10x10x8xf32, #tpu.memory_space<vmem>>, vector<8x8x8xf32>
    %48 = vector.shape_cast %47 : vector<8x8x8xf32> to vector<64x8xf32>
    %49 = arith.truncf %48 : vector<64x8xf32> to vector<64x8xbf16>
    %c4 = arith.constant 4 : index
    %c0_52 = arith.constant 0 : index
    %c0_53 = arith.constant 0 : index
    %50 = vector.load %arg4[%c4, %c0_52, %c0_53] : memref<9x8x8xbf16, #tpu.memory_space<vmem>>, vector<1x8x8xbf16>
    %51 = vector.shape_cast %50 : vector<1x8x8xbf16> to vector<8x8xbf16>
    %cst_54 = arith.constant dense<0.000000e+00> : vector<64x8xf32>
    %52 = tpu.matmul %49, %51, %cst_54 {dimension_numbers = #tpu.dot_dimension_numbers<[1], [0], [0], [1], [0, 0, 1, 1], [], []>} : vector<64x8xbf16>, vector<8x8xbf16>, vector<64x8xf32> -> vector<64x8xf32>
    %53 = arith.addf %46, %52 : vector<64x8xf32>
    %c1_55 = arith.constant 1 : index
    %c2_56 = arith.constant 2 : index
    %c0_57 = arith.constant 0 : index
    %54 = vector.load %arg9[%c1_55, %c2_56, %c0_57] : memref<10x10x8xf32, #tpu.memory_space<vmem>>, vector<8x8x8xf32>
    %55 = vector.shape_cast %54 : vector<8x8x8xf32> to vector<64x8xf32>
    %56 = arith.truncf %55 : vector<64x8xf32> to vector<64x8xbf16>
    %c5 = arith.constant 5 : index
    %c0_58 = arith.constant 0 : index
    %c0_59 = arith.constant 0 : index
    %57 = vector.load %arg4[%c5, %c0_58, %c0_59] : memref<9x8x8xbf16, #tpu.memory_space<vmem>>, vector<1x8x8xbf16>
    %58 = vector.shape_cast %57 : vector<1x8x8xbf16> to vector<8x8xbf16>
    %cst_60 = arith.constant dense<0.000000e+00> : vector<64x8xf32>
    %59 = tpu.matmul %56, %58, %cst_60 {dimension_numbers = #tpu.dot_dimension_numbers<[1], [0], [0], [1], [0, 0, 1, 1], [], []>} : vector<64x8xbf16>, vector<8x8xbf16>, vector<64x8xf32> -> vector<64x8xf32>
    %60 = arith.addf %53, %59 : vector<64x8xf32>
    %c2_61 = arith.constant 2 : index
    %c0_62 = arith.constant 0 : index
    %c0_63 = arith.constant 0 : index
    %61 = vector.load %arg9[%c2_61, %c0_62, %c0_63] : memref<10x10x8xf32, #tpu.memory_space<vmem>>, vector<8x8x8xf32>
    %62 = vector.shape_cast %61 : vector<8x8x8xf32> to vector<64x8xf32>
    %63 = arith.truncf %62 : vector<64x8xf32> to vector<64x8xbf16>
    %c6 = arith.constant 6 : index
    %c0_64 = arith.constant 0 : index
    %c0_65 = arith.constant 0 : index
    %64 = vector.load %arg4[%c6, %c0_64, %c0_65] : memref<9x8x8xbf16, #tpu.memory_space<vmem>>, vector<1x8x8xbf16>
    %65 = vector.shape_cast %64 : vector<1x8x8xbf16> to vector<8x8xbf16>
    %cst_66 = arith.constant dense<0.000000e+00> : vector<64x8xf32>
    %66 = tpu.matmul %63, %65, %cst_66 {dimension_numbers = #tpu.dot_dimension_numbers<[1], [0], [0], [1], [0, 0, 1, 1], [], []>} : vector<64x8xbf16>, vector<8x8xbf16>, vector<64x8xf32> -> vector<64x8xf32>
    %67 = arith.addf %60, %66 : vector<64x8xf32>
    %c2_67 = arith.constant 2 : index
    %c1_68 = arith.constant 1 : index
    %c0_69 = arith.constant 0 : index
    %68 = vector.load %arg9[%c2_67, %c1_68, %c0_69] : memref<10x10x8xf32, #tpu.memory_space<vmem>>, vector<8x8x8xf32>
    %69 = vector.shape_cast %68 : vector<8x8x8xf32> to vector<64x8xf32>
    %70 = arith.truncf %69 : vector<64x8xf32> to vector<64x8xbf16>
    %c7 = arith.constant 7 : index
    %c0_70 = arith.constant 0 : index
    %c0_71 = arith.constant 0 : index
    %71 = vector.load %arg4[%c7, %c0_70, %c0_71] : memref<9x8x8xbf16, #tpu.memory_space<vmem>>, vector<1x8x8xbf16>
    %72 = vector.shape_cast %71 : vector<1x8x8xbf16> to vector<8x8xbf16>
    %cst_72 = arith.constant dense<0.000000e+00> : vector<64x8xf32>
    %73 = tpu.matmul %70, %72, %cst_72 {dimension_numbers = #tpu.dot_dimension_numbers<[1], [0], [0], [1], [0, 0, 1, 1], [], []>} : vector<64x8xbf16>, vector<8x8xbf16>, vector<64x8xf32> -> vector<64x8xf32>
    %74 = arith.addf %67, %73 : vector<64x8xf32>
    %c2_73 = arith.constant 2 : index
    %c2_74 = arith.constant 2 : index
    %c0_75 = arith.constant 0 : index
    %75 = vector.load %arg9[%c2_73, %c2_74, %c0_75] : memref<10x10x8xf32, #tpu.memory_space<vmem>>, vector<8x8x8xf32>
    %76 = vector.shape_cast %75 : vector<8x8x8xf32> to vector<64x8xf32>
    %77 = arith.truncf %76 : vector<64x8xf32> to vector<64x8xbf16>
    %c8 = arith.constant 8 : index
    %c0_76 = arith.constant 0 : index
    %c0_77 = arith.constant 0 : index
    %78 = vector.load %arg4[%c8, %c0_76, %c0_77] : memref<9x8x8xbf16, #tpu.memory_space<vmem>>, vector<1x8x8xbf16>
    %79 = vector.shape_cast %78 : vector<1x8x8xbf16> to vector<8x8xbf16>
    %cst_78 = arith.constant dense<0.000000e+00> : vector<64x8xf32>
    %80 = tpu.matmul %77, %79, %cst_78 {dimension_numbers = #tpu.dot_dimension_numbers<[1], [0], [0], [1], [0, 0, 1, 1], [], []>} : vector<64x8xbf16>, vector<8x8xbf16>, vector<64x8xf32> -> vector<64x8xf32>
    %81 = arith.addf %74, %80 : vector<64x8xf32>
    %c0_79 = arith.constant 0 : index
    %c0_80 = arith.constant 0 : index
    %c0_81 = arith.constant 0 : index
    %82 = vector.load %arg6[%c0_79, %c0_80, %c0_81] : memref<1x64x8xf32, #tpu.memory_space<vmem>>, vector<1x64x8xf32>
    %83 = vector.shape_cast %82 : vector<1x64x8xf32> to vector<64x8xf32>
    %84 = vector.shape_cast %81 : vector<64x8xf32> to vector<1x64x8xf32>
    tpu.vector_store %arg6[%c0_79, %c0_80, %c0_81], %84 {strides = array<i32>} : memref<1x64x8xf32, #tpu.memory_space<vmem>>, vector<1x64x8xf32>,
    %cst_82 = arith.constant dense<0.000000e+00> : vector<8xf32>
    %85 = vector.multi_reduction <add>, %81, %cst_82 [0] : vector<64x8xf32> to vector<8xf32>
    %86 = vector.shape_cast %85 : vector<8xf32> to vector<1x8xf32>
    %cst_83 = arith.constant 1.562500e-02 : f32
    %87 = vector.broadcast %cst_83 : f32 to vector<1x8xf32>
    %88 = arith.mulf %86, %87 : vector<1x8xf32>
    %89 = vector.broadcast %88 : vector<1x8xf32> to vector<64x8xf32>
    %90 = arith.subf %81, %89 : vector<64x8xf32>
    %c0_84 = arith.constant 0 : index
    %c0_85 = arith.constant 0 : index
    %c0_86 = arith.constant 0 : index
    %91 = vector.load %arg7[%c0_84, %c0_85, %c0_86] : memref<1x1x8xf32, #tpu.memory_space<vmem>>, vector<1x1x8xf32>
    %92 = vector.shape_cast %91 : vector<1x1x8xf32> to vector<1x8xf32>
    %93 = vector.shape_cast %86 : vector<1x8xf32> to vector<1x1x8xf32>
    tpu.vector_store %arg7[%c0_84, %c0_85, %c0_86], %93 {strides = array<i32>} : memref<1x1x8xf32, #tpu.memory_space<vmem>>, vector<1x1x8xf32>,
    %94 = arith.mulf %90, %90 : vector<64x8xf32>
    %cst_87 = arith.constant dense<0.000000e+00> : vector<8xf32>
    %95 = vector.multi_reduction <add>, %94, %cst_87 [0] : vector<64x8xf32> to vector<8xf32>
    %96 = vector.shape_cast %95 : vector<8xf32> to vector<1x8xf32>
    %c0_88 = arith.constant 0 : index
    %c0_89 = arith.constant 0 : index
    %c0_90 = arith.constant 0 : index
    %97 = vector.load %arg8[%c0_88, %c0_89, %c0_90] : memref<1x1x8xf32, #tpu.memory_space<vmem>>, vector<1x1x8xf32>
    %98 = vector.shape_cast %97 : vector<1x1x8xf32> to vector<1x8xf32>
    %99 = vector.shape_cast %96 : vector<1x8xf32> to vector<1x1x8xf32>
    tpu.vector_store %arg8[%c0_88, %c0_89, %c0_90], %99 {strides = array<i32>} : memref<1x1x8xf32, #tpu.memory_space<vmem>>, vector<1x1x8xf32>,
    return
  }
  func.func @transform_0(%arg0: i32) -> (i32, i32, i32) {
    %c0_i32 = arith.constant 0 : i32
    %c0_i32_0 = arith.constant 0 : i32
    %c0_i32_1 = arith.constant 0 : i32
    return %arg0, %c0_i32, %c0_i32_0 : i32, i32, i32
  }
  func.func @transform_1(%arg0: i32) -> (i32, i32) {
    %c0_i32 = arith.constant 0 : i32
    %c0_i32_0 = arith.constant 0 : i32
    %c0_i32_1 = arith.constant 0 : i32
    return %c0_i32, %c0_i32_0 : i32, i32
  }
  func.func @transform_2(%arg0: i32) -> (i32, i32) {
    %c0_i32 = arith.constant 0 : i32
    %c0_i32_0 = arith.constant 0 : i32
    %c0_i32_1 = arith.constant 0 : i32
    return %c0_i32, %c0_i32_0 : i32, i32
  }
  func.func @transform_3(%arg0: i32) -> (i32, i32, i32) {
    %c0_i32 = arith.constant 0 : i32
    %c0_i32_0 = arith.constant 0 : i32
    %c0_i32_1 = arith.constant 0 : i32
    %c0_i32_2 = arith.constant 0 : i32
    return %c0_i32, %c0_i32_0, %c0_i32_1 : i32, i32, i32
  }
  func.func @transform_4(%arg0: i32) -> (i32, i32) {
    %c0_i32 = arith.constant 0 : i32
    %c0_i32_0 = arith.constant 0 : i32
    %c0_i32_1 = arith.constant 0 : i32
    return %c0_i32, %c0_i32_0 : i32, i32
  }
  func.func @transform_5(%arg0: i32) -> (i32, i32, i32) {
    %c0_i32 = arith.constant 0 : i32
    %c0_i32_0 = arith.constant 0 : i32
    %c0_i32_1 = arith.constant 0 : i32
    return %arg0, %c0_i32, %c0_i32_0 : i32, i32, i32
  }
  func.func @transform_6(%arg0: i32) -> (i32, i32, i32) {
    %c0_i32 = arith.constant 0 : i32
    %c0_i32_0 = arith.constant 0 : i32
    %c0_i32_1 = arith.constant 0 : i32
    return %arg0, %c0_i32, %c0_i32_0 : i32, i32, i32
  }
  func.func @transform_7(%arg0: i32) -> (i32, i32, i32) {
    %c0_i32 = arith.constant 0 : i32
    %c0_i32_0 = arith.constant 0 : i32
    %c0_i32_1 = arith.constant 0 : i32
    return %arg0, %c0_i32, %c0_i32_0 : i32, i32, i32
  }
}

module attributes {stable_mosaic.version = 11 : i64} {
  func.func @_bnrelu_t_kernel(%arg0: i32, %arg1: memref<1x64x8xf32, #tpu.memory_space<vmem>>, %arg2: memref<1x8xf32, #tpu.memory_space<vmem>>, %arg3: memref<1x8xf32, #tpu.memory_space<vmem>>, %arg4: memref<1x8x64xf32, #tpu.memory_space<vmem>>) attributes {dimension_semantics = [#tpu.dimension_semantics<parallel>], iteration_bounds = array<i64: 2>, scalar_prefetch = 0 : i64, scratch_operands = 0 : i64, tpu.core_type = #tpu.core_type<tc>, window_params = [{transform_indices = @transform_0, window_bounds = array<i64: 1, 64, 8>}, {pipeline_mode = #tpu.pipeline_mode<synchronous>, transform_indices = @transform_1, window_bounds = array<i64: 1, 8>}, {pipeline_mode = #tpu.pipeline_mode<synchronous>, transform_indices = @transform_2, window_bounds = array<i64: 1, 8>}, {transform_indices = @transform_3, window_bounds = array<i64: 1, 8, 64>}]} {
    %c0 = arith.constant 0 : index
    %c0_0 = arith.constant 0 : index
    %c0_1 = arith.constant 0 : index
    %0 = vector.load %arg1[%c0, %c0_0, %c0_1] : memref<1x64x8xf32, #tpu.memory_space<vmem>>, vector<1x64x8xf32>
    %1 = vector.shape_cast %0 : vector<1x64x8xf32> to vector<64x8xf32>
    %c0_2 = arith.constant 0 : index
    %c0_3 = arith.constant 0 : index
    %2 = vector.load %arg2[%c0_2, %c0_3] : memref<1x8xf32, #tpu.memory_space<vmem>>, vector<1x8xf32>
    %3 = vector.broadcast %2 : vector<1x8xf32> to vector<64x8xf32>
    %4 = arith.mulf %1, %3 : vector<64x8xf32>
    %c0_4 = arith.constant 0 : index
    %c0_5 = arith.constant 0 : index
    %5 = vector.load %arg3[%c0_4, %c0_5] : memref<1x8xf32, #tpu.memory_space<vmem>>, vector<1x8xf32>
    %6 = vector.broadcast %5 : vector<1x8xf32> to vector<64x8xf32>
    %7 = arith.addf %4, %6 : vector<64x8xf32>
    %cst = arith.constant 0.000000e+00 : f32
    %8 = vector.broadcast %cst : f32 to vector<64x8xf32>
    %9 = arith.maximumf %7, %8 : vector<64x8xf32>
    %10 = tpu.transpose %9, [1, 0] : vector<64x8xf32> -> vector<8x64xf32>
    %c0_6 = arith.constant 0 : index
    %c0_7 = arith.constant 0 : index
    %c0_8 = arith.constant 0 : index
    %11 = vector.load %arg4[%c0_6, %c0_7, %c0_8] : memref<1x8x64xf32, #tpu.memory_space<vmem>>, vector<1x8x64xf32>
    %12 = vector.shape_cast %11 : vector<1x8x64xf32> to vector<8x64xf32>
    %13 = vector.shape_cast %10 : vector<8x64xf32> to vector<1x8x64xf32>
    tpu.vector_store %arg4[%c0_6, %c0_7, %c0_8], %13 {strides = array<i32>} : memref<1x8x64xf32, #tpu.memory_space<vmem>>, vector<1x8x64xf32>,
    return
  }
  func.func @transform_0(%arg0: i32) -> (i32, i32, i32) {
    %c0_i32 = arith.constant 0 : i32
    %c0_i32_0 = arith.constant 0 : i32
    %c0_i32_1 = arith.constant 0 : i32
    return %arg0, %c0_i32, %c0_i32_0 : i32, i32, i32
  }
  func.func @transform_1(%arg0: i32) -> (i32, i32) {
    %c0_i32 = arith.constant 0 : i32
    %c0_i32_0 = arith.constant 0 : i32
    %c0_i32_1 = arith.constant 0 : i32
    return %c0_i32, %c0_i32_0 : i32, i32
  }
  func.func @transform_2(%arg0: i32) -> (i32, i32) {
    %c0_i32 = arith.constant 0 : i32
    %c0_i32_0 = arith.constant 0 : i32
    %c0_i32_1 = arith.constant 0 : i32
    return %c0_i32, %c0_i32_0 : i32, i32
  }
  func.func @transform_3(%arg0: i32) -> (i32, i32, i32) {
    %c0_i32 = arith.constant 0 : i32
    %c0_i32_0 = arith.constant 0 : i32
    %c0_i32_1 = arith.constant 0 : i32
    return %arg0, %c0_i32, %c0_i32_0 : i32, i32, i32
  }
}

</mosaic_0001>

<bundles_post_ra>
// kernel: down_forward.5
= control target key start
LH: loop header
LB: loop body
LE: loop exit
PB: predicated region body
PF: predicated region fallthrough
CT: control target
= control target key end

     0   :  { %s346_s12 = smov 0   ;;  %s383_s0 = inlined_call_operand.vmem [shape: f32[2,64,8], index: 0, kind: input, shape index: {}]   ;;  %s384_s1 = inlined_call_operand.vmem [shape: f32[1,8], index: 1, kind: input, shape index: {}]   ;;  %s385_s2 = inlined_call_operand.vmem [shape: f32[1,8], index: 2, kind: input, shape index: {}]   ;;  %s386_s3 = inlined_call_operand.vmem [shape: f32[2,8,64], index: 3, kind: output, shape index: {}]  }
   0x1 LB: > { %s296_s13 = sadd.s32 4294967295, %s324_s12   ;;  %p300_p0 = scmp.ge.s32.totalorder %s324_s12, 1  ;;  %s324_s12 = sphi %s346_s12, %s13_s12  }
   0x2   : > { %p137_p1 = scmp.lt.s32.totalorder %s324_s12, 3 }
   0x4   : > { %p138_p2 = pnand %p300_p0, %p137_p1 }
   0x5   : > { %p160_p3 = scmp.lt.s32.totalorder (!%p138_p2), %s296_s13, 1 }
   0x6   : > { %141 = sbr.rel (%p138_p2) target bundleno = 187 (0xbb), region = 32 }
   0xb   : > { %s388_s13 = smov (!%p160_p3, %s296_s13), 1  ;;  %v316_v0 = vld [vmem:[%s384_s1] ss:$0 sm:$0xff]  ;;  %vm241_vm0 = vcmask 523264  }
   0xc   : > { %s306_s16 = sshll.u32 %s388_s13, 6  ;;  %v317_v1 = vld [vmem:[%s385_s2] ss:$0 sm:$0xff]  ;;  %s303_s22 = sshll.u32 %s388_s13, 3 }
   0xd   : > { %s363_s19 = scalar_lea.vmem %s383_s0, %s306_s16  ;;  %s168_s25 = scalar_lea.vmem %s386_s3, %s303_s22 }
   0xe   : > { %v169_v2 = vld [vmem:[%s363_s19] sm:$0xff]  ;;  %v170_v3 = vld [vmem:[%s363_s19 + $0x8] sm:$0xff]  ;;  %v171_v9 = vld [vmem:[%s363_s19 + $0x10] sm:$0xff] }
   0xf   : > { %v181_v4 = vmul.f32 %v316_v0, %v169_v2  ;;  %v182_v6 = vmul.f32 %v316_v0, %v170_v3  ;;  %v183_v11 = vmul.f32 %v316_v0, %v171_v9  ;;  %v172_v13 = vld [vmem:[%s363_s19 + $0x18] sm:$0xff]  ;;  %v173_v17 = vld [vmem:[%s363_s19 + $0x20] sm:$0xff]  ;;  %v174_v21 = vld [vmem:[%s363_s19 + $0x28] sm:$0xff] }
  0x10   : > { %v184_v15 = vmul.f32 %v316_v0, %v172_v13  ;;  %v185_v19 = vmul.f32 %v316_v0, %v173_v17  ;;  %v186_v23 = vmul.f32 %v316_v0, %v174_v21  ;;  %v175_v25 = vld [vmem:[%s363_s19 + $0x30] sm:$0xff]  ;;  %v176_v29 = vld [vmem:[%s363_s19 + $0x38] sm:$0xff] }
  0x11   : > { %v193_v5 = vadd.f32 %v317_v1, %v181_v4  ;;  %v194_v8 = vadd.f32 %v317_v1, %v182_v6  ;;  %v195_v12 = vadd.f32 %v317_v1, %v183_v11  ;;  %v187_v27 = vmul.f32 %v316_v0, %v175_v25 }
  0x12   : > { %v196_v16 = vadd.f32 %v317_v1, %v184_v15  ;;  %v197_v20 = vadd.f32 %v317_v1, %v185_v19  ;;  %v198_v24 = vadd.f32 %v317_v1, %v186_v23  ;;  %v188_v31 = vmul.f32 %v316_v0, %v176_v29 }
  0x13   : > { %v201_v7 = vmax.f32 %v193_v5, 0.0  ;;  %v202_v10 = vmax.f32 %v194_v8, 0.0  ;;  %v203_v14 = vmax.f32 %v195_v12, 0.0  ;;  %v199_v28 = vadd.f32 %v317_v1, %v187_v27 }
  0x14   : > { %v204_v18 = vmax.f32 %v196_v16, 0.0  ;;  %v205_v22 = vmax.f32 %v197_v20, 0.0  ;;  %v206_v26 = vmax.f32 %v198_v24, 0.0  ;;  %v200_v32 = vadd.f32 %v317_v1, %v188_v31 }
  0x15   : > { %209 = vxpose.xlu0.b32.start [1/8] (short) (narrow) %v201_v7, 8  ;;  %v207_v30 = vmax.f32 %v199_v28, 0.0 }
  0x16   : > { %v208_v33 = vmax.f32 %v200_v32, 0.0 }
  0x1d   : > { %210 = vxpose.xlu0.b32.cont [2/8] (short) (narrow) %v202_v10, 8 }
  0x25   : > { %211 = vxpose.xlu0.b32.cont [3/8] (short) (narrow) %v203_v14, 8 }
  0x2d   : > { %212 = vxpose.xlu0.b32.cont [4/8] (short) (narrow) %v204_v18, 8 }
  0x35   : > { %213 = vxpose.xlu0.b32.cont [5/8] (short) (narrow) %v205_v22, 8 }
  0x3d   : > { %214 = vxpose.xlu0.b32.cont [6/8] (short) (narrow) %v206_v26, 8 }
  0x45   : > { %215 = vxpose.xlu0.b32.cont [7/8] (short) (narrow) %v207_v30, 8 }
  0x4d   : > { %216 = vxpose.xlu0.b32.end [8/8] (short) (narrow) %v208_v33, 8 }
  0xb9   : > { %v225_v34 = vpop.trf.xlu0 }
  0xba   : > { %242 = vst.msk [vmem:[%s168_s25] sm:$0xff] %vm241_vm0, %v225_v34 }
  0xbb PF: > { %s13_s12 = sadd.s32 1, %s324_s12  }
  0xbc   : > { %p10_p4 = scmp.ge.s32.totalorder %s13_s12, 4  }
  0xbe   :  { %12 = sbr.rel (!%p10_p4) target bundleno = 1 (0x1), region = 62 }

// kernel: down_forward.3
= control target key start
LH: loop header
LB: loop body
LE: loop exit
PB: predicated region body
PF: predicated region fallthrough
CT: control target
= control target key end

     0   :  { %s1233_s18 = smov 0   ;;  %s1560_s0 = inlined_call_operand.vmem [shape: f32[2,8,2,8,8], index: 0, kind: input, shape index: {}]   ;;  %s1561_s1 = inlined_call_operand.vmem [shape: bf16[9,4,8], index: 1, kind: input, shape index: {}]   ;;  %s1562_s2 = inlined_call_operand.vmem [shape: f32[64,8], index: 2, kind: input, shape index: {}]   ;;  %s1563_s3 = inlined_call_operand.vmem [shape: f32[2,64,8], index: 3, kind: output, shape index: {0}]   ;;  %s1564_s4 = inlined_call_operand.vmem [shape: f32[2,1,8], index: 4, kind: output, shape index: {1}]   ;;  %s1565_s5 = inlined_call_operand.vmem [shape: f32[2,1,8], index: 5, kind: output, shape index: {2}]  }
   0x1 LB: > { %s1123_s19 = sadd.s32 4294967295, %s1199_s18   ;;  %p1127_p0 = scmp.ge.s32.totalorder %s1199_s18, 1  ;;  %s1199_s18 = sphi %s1233_s18, %s16_s18  }
   0x2   : > { %p192_p1 = scmp.lt.s32.totalorder %s1199_s18, 3 }
   0x4   : > { %p193_p2 = pnand %p1127_p0, %p192_p1 }
   0x5   : > { %p226_p3 = scmp.lt.s32.totalorder (!%p193_p2), %s1123_s19, 1  ;;  %s1201_s24 = smov (!%p193_p2), 124  }
   0x6   : > { %196 = sbr.rel (%p193_p2) target bundleno = 476 (0x1dc), region = 32 }
   0xb   : > { %s1567_s19 = smov (!%p226_p3, %s1123_s19), 1  ;;  %vm314_vm0 = vcmask 24576   ;;  %v1202_v24 = vmov 0.0   ;;  %vm307_vm1 = vcmask 31744   ;;  %v364_v25 = vld [vmem:[%s1561_s1] sm:$0x3] }
   0xc   : > { %s1178_s20 = sshll.u32 %s1567_s19, 7  ;;  %317 = vst.msk [vmem:[#allocation2 + $0x20] sm:$0x1] %vm314_vm0, %v1202_v24  ;;  %vm377_vm2 = vcmask 1041408   ;;  %vm309_vm3 = vcmask 25600   ;;  %s1179_s26 = sshll.u32 %s1567_s19, 6 }
   0xd   : > { %s230_s23 = scalar_lea.vmem %s1560_s0, %s1178_s20  ;;  %318 = vst.msk [vmem:[#allocation2 + $0x30] sm:$0x1] %vm314_vm0, %v1202_v24  ;;  %v379_v26 = vsel %vm377_vm2, %v364_v25, 0  ;;  %v1141_v31 = vld [vmem:[%s1561_s1 + $0x4] sm:$0x3]  ;;  %s1455_s29 = scalar_lea.vmem %s1563_s3, %s1179_s26  ;;  %vm947_vm4 = vcmask 64512  }
   0xe   : > { %v253_v0 = vld [vmem:[%s230_s23 + $0x50] sm:$0xff]  ;;  %v254_v1 = vld [vmem:[%s230_s23 + $0x58] sm:$0xff]  ;;  %v255_v8 = vld [vmem:[%s230_s23 + $0x60] sm:$0xff]  ;;  %308 = vst.msk [vmem:[#allocation2] sm:$0xff] %vm307_vm1, %v1202_v24  ;;  %1180 = vmatpush.bf16.msra.mxu1 %v379_v26  ;;  %1181 = vmatpush.bf16.msra.mxu2 %v379_v26  ;;  %v511_v33 = vsel %vm377_vm2, %v1141_v31, 0  ;;  %s238_s17 = scalar_lea.vmem %s1564_s4, %s1567_s19  ;;  %vm986_vm5 = vcmask 57344   ;;  %s241_s22 = scalar_lea.vmem %s1565_s5, %s1567_s19 }
   0xf   : > { %v249_v2 = vld [vmem:[%s230_s23 + $0x30] sm:$0xff]  ;;  %v1247_v3 = vmax.f32 %v253_v0, %v254_v1  ;;  %v250_v4 = vld [vmem:[%s230_s23 + $0x38] sm:$0xff]  ;;  %v256_v9 = vld [vmem:[%s230_s23 + $0x68] sm:$0xff]  ;;  %312 = vst.msk [vmem:[#allocation2 + $0x90] sm:$0xff] %vm307_vm1, %v1202_v24  ;;  %1182 = vmatpush.bf16.msra.mxu3 %v379_v26  ;;  %388 = vmatpush.bf16.msra.mxu0 %v379_v26 }
  0x10   : > { %v1249_v5 = vmax.f32 %v249_v2, %v250_v4  ;;  %v245_v6 = vld [vmem:[%s230_s23 + $0x10] sm:$0xff]  ;;  %v246_v7 = vld [vmem:[%s230_s23 + $0x18] sm:$0xff]  ;;  %v251_v11 = vld [vmem:[%s230_s23 + $0x40] sm:$0xff]  ;;  %v1253_v13 = vmax.f32 %v255_v8, %v256_v9  ;;  %316 = vst.msk [vmem:[#allocation2 + $0x10] sm:$0x1] %vm314_vm0, %v1202_v24 }
  0x11   : > { %285 = vrot.lane.b32.xlu1 %v1247_v3, %s1201_s24  ;;  %v260_v10 = vmax.f32 %v245_v6, %v246_v7  ;;  %v252_v12 = vld [vmem:[%s230_s23 + $0x48] sm:$0xff]  ;;  %v247_v14 = vld [vmem:[%s230_s23 + $0x20] sm:$0xff]  ;;  %v257_v18 = vld [vmem:[%s230_s23 + $0x70] sm:$0xff]  ;;  %319 = vst.msk [vmem:[#allocation2 + $0x40] sm:$0x1] %vm314_vm0, %v1202_v24 }
  0x12   : > { %281 = vrot.lane.b32.xlu0 %v1249_v5, %s1201_s24  ;;  %v248_v15 = vld [vmem:[%s230_s23 + $0x28] sm:$0xff]  ;;  %v1255_v16 = vmax.f32 %v251_v11, %v252_v12  ;;  %v258_v19 = vld [vmem:[%s230_s23 + $0x78] sm:$0xff]  ;;  %v243_v20 = vld [vmem:[%s230_s23] sm:$0xff]  ;;  %320 = vst.msk [vmem:[#allocation2 + $0x50] sm:$0x1] %vm314_vm0, %v1202_v24  ;;  %520 = vmatpush.bf16.msrb.mxu2 %v511_v33 }
  0x13   : > { %277 = vrot.lane.b32.xlu2 %v260_v10, %s1201_s24  ;;  %v261_v17 = vmax.f32 %v247_v14, %v248_v15  ;;  %v244_v21 = vld [vmem:[%s230_s23 + $0x8] sm:$0xff]  ;;  %v1259_v22 = vmax.f32 %v257_v18, %v258_v19  ;;  %321 = vst.msk [vmem:[#allocation2 + $0x60] sm:$0x1] %vm314_vm0, %v1202_v24  ;;  %v1146_v32 = vld [vmem:[%s1561_s1 + $0x6] sm:$0x3] }
  0x14   : > { %v1261_v23 = vmax.f32 %v243_v20, %v244_v21  ;;  %322 = vst.msk [vmem:[#allocation2 + $0x70] sm:$0x1] %vm314_vm0, %v1202_v24  ;;  %v577_v34 = vsel %vm377_vm2, %v1146_v32, 0  ;;  %v1136_v35 = vld [vmem:[%s1561_s1 + $0x2] sm:$0x3] }
  0x15   : > { %323 = vst.msk [vmem:[#allocation2 + $0x80] sm:$0x1] %vm314_vm0, %v1202_v24  ;;  %586 = vmatpush.bf16.msrb.mxu3 %v577_v34  ;;  %v445_v36 = vsel %vm377_vm2, %v1136_v35, 0  ;;  %v1151_v40 = vld [vmem:[%s1561_s1 + $0x8] sm:$0x3] }
  0x16   : > { %326 = vst.msk [vmem:[#allocation2 + $0x19] sm:$0x1] %vm314_vm0, %v1202_v24  ;;  %454 = vmatpush.bf16.msrb.mxu1 %v445_v36  ;;  %v643_v41 = vsel %vm377_vm2, %v1151_v40, 0  ;;  %v1156_v46 = vld [vmem:[%s1561_s1 + $0xa] sm:$0x3] }
  0x17   : > { %327 = vst.msk [vmem:[#allocation2 + $0x29] sm:$0x1] %vm314_vm0, %v1202_v24  ;;  %652 = vmatpush.bf16.msrb.mxu0 %v643_v41  ;;  %v709_v47 = vsel %vm377_vm2, %v1156_v46, 0  ;;  %v1166_v53 = vld [vmem:[%s1561_s1 + $0xe] sm:$0x3] }
  0x18   : > { %328 = vst.msk [vmem:[#allocation2 + $0x39] sm:$0x1] %vm314_vm0, %v1202_v24  ;;  %v1161_v56 = vld [vmem:[%s1561_s1 + $0xc] sm:$0x3]  ;;  %v842_v63 = vsel %vm377_vm2, %v1166_v53, 0 }
  0x19   : > { %287 = vrot.lane.b32.xlu1 %v1253_v13, %s1201_s24  ;;  %329 = vst.msk [vmem:[#allocation2 + $0x49] sm:$0x1] %vm314_vm0, %v1202_v24  ;;  %v776_v1 = vsel %vm377_vm2, %v1161_v56, 0  ;;  %v1171_v4 = vld [vmem:[%s1561_s1 + $0x10] sm:$0x3] }
  0x1a   : > { %283 = vrot.lane.b32.xlu0 %v1255_v16, %s1201_s24  ;;  %330 = vst.msk [vmem:[#allocation2 + $0x59] sm:$0x1] %vm314_vm0, %v1202_v24  ;;  %v908_v9 = vsel %vm377_vm2, %v1171_v4, 0 }
  0x1b   : > { %279 = vrot.lane.b32.xlu2 %v261_v17, %s1201_s24  ;;  %331 = vst.msk [vmem:[#allocation2 + $0x69] sm:$0x1] %vm314_vm0, %v1202_v24 }
  0x1c   : > { %332 = vst.msk [vmem:[#allocation2 + $0x79] sm:$0x1] %vm314_vm0, %v1202_v24 }
  0x1d   : > { %333 = vst.msk [vmem:[#allocation2 + $0x89] sm:$0x1] %vm314_vm0, %v1202_v24 }
  0x1e   : > { %315 = vst.msk [vmem:[#allocation2] sm:$0x1] %vm314_vm0, %v1202_v24 }
  0x1f   : > { %324 = vst.msk [vmem:[#allocation2 + $0x90] sm:$0x1] %vm314_vm0, %v1202_v24 }
  0x20   : > { %310 = vst.msk [vmem:[#allocation2 + $0x8] sm:$0x3] %vm309_vm3, %v1202_v24 }
  0x21   : > { %289 = vrot.lane.b32.xlu1 %v1259_v22, %s1201_s24  ;;  %313 = vst.msk [vmem:[#allocation2 + $0x98] sm:$0x3] %vm309_vm3, %v1202_v24 }
  0x22   : > { %275 = vrot.lane.b32.xlu0 %v1261_v23, %s1201_s24  ;;  %325 = vst.msk [vmem:[#allocation2 + $0x9] sm:$0x1] %vm314_vm0, %v1202_v24 }
  0x23   : > { %334 = vst.msk [vmem:[#allocation2 + $0x99] sm:$0x1] %vm314_vm0, %v1202_v24 }
  0x25   : > { %v352_v2 = vld [vmem:[#allocation2] sm:$0xff] }
  0x6d   : > { %v278_v27 = vpop.permute.xlu2 %277 }
  0x6e   : > { %v300_v28 = vmax.f32 %v260_v10, %v278_v27  ;;  %v484_v10 = vld [vmem:[#allocation2 + $0x2] sm:$0xff] }
  0x70   : > { %337 = vst.msk [vmem:[#allocation2 + $0x21] sm:$0xff] %vm307_vm1, %v300_v28 }
  0x75   : > { %v280_v29 = vpop.permute.xlu2 %279 }
  0x76   : > { %v301_v30 = vmax.f32 %v261_v17, %v280_v29 }
  0x77   : > { %v354_v37 = vld [vmem:[#allocation2 + $0x20] sm:$0xff] }
  0x78   : > { %338 = vst.msk [vmem:[#allocation2 + $0x31] sm:$0xff] %vm307_vm1, %v301_v30  ;;  %v420_v14 = vld [vmem:[#allocation2 + $0x21] sm:$0xff] }
  0x79   : > { %v486_v18 = vld [vmem:[#allocation2 + $0x22] sm:$0xff] }
  0x7f   : > { %v1305_v38 = vld [vmem:[#allocation2 + $0x30] sm:$0xff] }
  0x80   : > { %v1308_v39 = vpack.c.bf16 %v1305_v38, %v354_v37  ;;  %v421_v15 = vld [vmem:[#allocation2 + $0x31] sm:$0xff] }
  0x81   : > { %v487_v19 = vld [vmem:[#allocation2 + $0x32] sm:$0xff] }
  0x82   : > { %1133 = vmatmul.msk.bf16.vlgmr.msra.gmra.mxu1 %vm307_vm1, %v1308_v39  ;;  %v493_v21 = vpack.c.bf16 %v487_v19, %v486_v18 }
  0x83   : > { %v286_v42 = vpop.permute.xlu1 %285  ;;  %718 = vmatpush.bf16.msra.mxu1 %v709_v47  ;;  %v822_v47 = vld [vmem:[#allocation2 + $0x91] sm:$0xff] }
  0x84   : > { %v304_v43 = vmax.f32 %v1247_v3, %v286_v42  ;;  %v282_v44 = vpop.permute.xlu0 %281  ;;  %v418_v3 = vld [vmem:[#allocation2 + $0x1] sm:$0xff] }
  0x85   : > { %v302_v45 = vmax.f32 %v1249_v5, %v282_v44 }
  0x86   : > { %341 = vst.msk [vmem:[#allocation2 + $0x61] sm:$0xff] %vm307_vm1, %v304_v43 }
  0x87   : > { %339 = vst.msk [vmem:[#allocation2 + $0x41] sm:$0xff] %vm307_vm1, %v302_v45 }
  0x8b   : > { %v288_v48 = vpop.permute.xlu1 %287 }
  0x8c   : > { %v305_v49 = vmax.f32 %v1253_v13, %v288_v48  ;;  %v284_v50 = vpop.permute.xlu0 %283  ;;  %v756_v48 = vld [vmem:[#allocation2 + $0x90] sm:$0xff] }
  0x8d   : > { %v303_v51 = vmax.f32 %v1255_v16, %v284_v50  ;;  %v358_v58 = vld [vmem:[#allocation2 + $0x60] sm:$0xff]  ;;  %v427_v16 = vpack.c.bf16 %v421_v15, %v420_v14 }
  0x8e   : > { %342 = vst.msk [vmem:[#allocation2 + $0x71] sm:$0xff] %vm307_vm1, %v305_v49  ;;  %v356_v60 = vld [vmem:[#allocation2 + $0x40] sm:$0xff] }
  0x8f   : > { %340 = vst.msk [vmem:[#allocation2 + $0x51] sm:$0xff] %vm307_vm1, %v303_v51  ;;  %v559_v20 = vpack.c.bf16 %v356_v60, %v1305_v38  ;;  %v488_v27 = vld [vmem:[#allocation2 + $0x42] sm:$0xff] }
  0x90   : > { %v424_v31 = vld [vmem:[#allocation2 + $0x61] sm:$0xff]  ;;  %v691_v43 = vpack.c.bf16 %v488_v27, %v487_v19 }
  0x91   : > { %v490_v36 = vld [vmem:[#allocation2 + $0x62] sm:$0xff] }
  0x93   : > { %v290_v52 = vpop.permute.xlu1 %289 }
  0x94   : > { %v306_v54 = vmax.f32 %v1259_v22, %v290_v52  ;;  %v276_v55 = vpop.permute.xlu0 %275  ;;  %v422_v22 = vld [vmem:[#allocation2 + $0x41] sm:$0xff] }
  0x95   : > { %v299_v57 = vmax.f32 %v1261_v23, %v276_v55  ;;  %v1336_v59 = vld [vmem:[#allocation2 + $0x70] sm:$0xff]  ;;  %v625_v25 = vpack.c.bf16 %v422_v22, %v421_v15 }
  0x96   : > { %343 = vst.msk [vmem:[#allocation2 + $0x81] sm:$0xff] %vm307_vm1, %v306_v54  ;;  %v357_v61 = vld [vmem:[#allocation2 + $0x50] sm:$0xff]  ;;  %v1340_v62 = vpack.c.bf16 %v1336_v59, %v358_v58 }
  0x97   : > { %336 = vst.msk [vmem:[#allocation2 + $0x11] sm:$0xff] %vm307_vm1, %v299_v57  ;;  %v1344_v0 = vpack.c.bf16 %v357_v61, %v356_v60  ;;  %v423_v23 = vld [vmem:[#allocation2 + $0x51] sm:$0xff]  ;;  %v560_v28 = vpack.c.bf16 %v358_v58, %v357_v61 }
  0x98   : > { %1135 = vmatmul.msk.bf16.vlgmr.msra.gmra.mxu3 %vm307_vm1, %v1340_v62  ;;  %v428_v24 = vpack.c.bf16 %v423_v23, %v422_v22  ;;  %v489_v26 = vld [vmem:[#allocation2 + $0x52] sm:$0xff]  ;;  %v626_v33 = vpack.c.bf16 %v424_v31, %v423_v23  ;;  %v344_v22 = vld [vmem:[%s1562_s2] sm:$0xff] }
  0x99   : > { %1134 = vmatmul.msk.bf16.vlgmr.msra.gmra.mxu2 %vm307_vm1, %v1344_v0  ;;  %851 = vmatpush.bf16.msra.mxu3 %v842_v63  ;;  %v494_v29 = vpack.c.bf16 %v489_v26, %v488_v27  ;;  %v425_v30 = vld [vmem:[#allocation2 + $0x71] sm:$0xff]  ;;  %v692_v44 = vpack.c.bf16 %v490_v36, %v489_v26 }
  0x9a   : > { %785 = vmatpush.bf16.msra.mxu2 %v776_v1  ;;  %v429_v32 = vpack.c.bf16 %v425_v30, %v424_v31  ;;  %v491_v35 = vld [vmem:[#allocation2 + $0x72] sm:$0xff] }
  0x9b   : > { %v495_v38 = vpack.c.bf16 %v491_v35, %v490_v36  ;;  %v888_v54 = vld [vmem:[#allocation2 + $0x92] sm:$0xff] }
  0x9d   : > { %v557_v34 = vld [vmem:[#allocation2 + $0x80] sm:$0xff] }
  0x9e   : > { %v353_v5 = vld [vmem:[#allocation2 + $0x10] sm:$0xff]  ;;  %v623_v40 = vld [vmem:[#allocation2 + $0x81] sm:$0xff]  ;;  %v760_v51 = vpack.c.bf16 %v756_v48, %v557_v34 }
  0x9f   : > { %v419_v6 = vld [vmem:[#allocation2 + $0x11] sm:$0xff]  ;;  %v360_v7 = vpack.c.bf16 %v353_v5, %v352_v2  ;;  %v558_v12 = vpack.c.bf16 %v354_v37, %v353_v5  ;;  %v561_v37 = vpack.c.bf16 %v557_v34, %v1336_v59  ;;  %v627_v41 = vpack.c.bf16 %v623_v40, %v425_v30  ;;  %v689_v45 = vld [vmem:[#allocation2 + $0x82] sm:$0xff] }
  0xa0   : > { %v426_v8 = vpack.c.bf16 %v419_v6, %v418_v3  ;;  %v485_v11 = vld [vmem:[#allocation2 + $0x12] sm:$0xff]  ;;  %v624_v17 = vpack.c.bf16 %v420_v14, %v419_v6  ;;  %v693_v46 = vpack.c.bf16 %v689_v45, %v491_v35  ;;  %v826_v50 = vpack.c.bf16 %v822_v47, %v623_v40 }
  0xa1   : > { %1132 = vmatmul.msk.bf16.vlgmr.msra.gmra.mxu0 %vm307_vm1, %v360_v7  ;;  %v492_v13 = vpack.c.bf16 %v485_v11, %v484_v10  ;;  %v690_v42 = vpack.c.bf16 %v486_v18, %v485_v11  ;;  %v892_v57 = vpack.c.bf16 %v888_v54, %v689_v45 }
  0xa2   : > { %1137 = vmatmul.msk.bf16.vlgmr.msrb.gmra.mxu1 %vm307_vm1, %v426_v8  ;;  %917 = vmatpush.bf16.msra.mxu0 %v908_v9 }
  0xa8   : > { %1147 = vmatmul.msk.bf16.vlgmr.msrb.gmra.mxu3 %vm307_vm1, %v558_v12 }
  0xa9   : > { %1142 = vmatmul.msk.bf16.vlgmr.msrb.gmra.mxu2 %vm307_vm1, %v492_v13 }
  0xb1   : > { %1152 = vmatmul.msk.bf16.vlgmr.msrb.gmra.mxu0 %vm307_vm1, %v624_v17 }
  0xb2   : > { %1138 = vmatmul.msk.bf16.gmra.mxu1 %vm307_vm1, %v427_v16 }
  0xb8   : > { %1148 = vmatmul.msk.bf16.gmra.mxu3 %vm307_vm1, %v559_v20 }
  0xb9   : > { %1143 = vmatmul.msk.bf16.gmra.mxu2 %vm307_vm1, %v493_v21 }
  0xc1   : > { %1153 = vmatmul.msk.bf16.gmra.mxu0 %vm307_vm1, %v625_v25 }
  0xc2   : > { %1139 = vmatmul.msk.bf16.gmra.mxu1 %vm307_vm1, %v428_v24 }
  0xc8   : > { %1149 = vmatmul.msk.bf16.gmra.mxu3 %vm307_vm1, %v560_v28 }
  0xc9   : > { %1144 = vmatmul.msk.bf16.gmra.mxu2 %vm307_vm1, %v494_v29 }
  0xd1   : > { %1154 = vmatmul.msk.bf16.gmra.mxu0 %vm307_vm1, %v626_v33 }
  0xd2   : > { %1140 = vmatmul.msk.bf16.gmra.mxu1 %vm307_vm1, %v429_v32 }
  0xd8   : > { %1150 = vmatmul.msk.bf16.gmra.mxu3 %vm307_vm1, %v561_v37 }
  0xd9   : > { %1145 = vmatmul.msk.bf16.gmra.mxu2 %vm307_vm1, %v495_v38 }
  0xe1   : > { %1155 = vmatmul.msk.bf16.gmra.mxu0 %vm307_vm1, %v627_v41  ;;  %v346_v41 = vld [vmem:[%s1562_s2 + $0x10] sm:$0xff] }
  0xe2   : > { %1157 = vmatmul.msk.bf16.vlgmr.msra.gmra.mxu1 %vm307_vm1, %v690_v42 }
  0xe8   : > { %1167 = vmatmul.msk.bf16.vlgmr.msra.gmra.mxu3 %vm307_vm1, %v427_v16 }
  0xe9   : > { %1162 = vmatmul.msk.bf16.vlgmr.msra.gmra.mxu2 %vm307_vm1, %v1308_v39 }
  0xf1   : > { %1172 = vmatmul.msk.bf16.vlgmr.msra.gmra.mxu0 %vm307_vm1, %v493_v21 }
  0xf2   : > { %1158 = vmatmul.msk.bf16.gmra.mxu1 %vm307_vm1, %v691_v43 }
  0xf8   : > { %1168 = vmatmul.msk.bf16.gmra.mxu3 %vm307_vm1, %v428_v24 }
  0xf9   : > { %1163 = vmatmul.msk.bf16.gmra.mxu2 %vm307_vm1, %v1344_v0 }
  0xff   : > { %v1388_v39 = vpop.f32.mrf.mxu1 }
 0x100   : > { %v412_v45 = vadd.f32 %v1388_v39, %v346_v41  ;;  %v347_v39 = vld [vmem:[%s1562_s2 + $0x18] sm:$0xff] }
 0x101   : > { %1173 = vmatmul.msk.bf16.gmra.mxu0 %vm307_vm1, %v494_v29  ;;  %v345_v29 = vld [vmem:[%s1562_s2 + $0x8] sm:$0xff] }
 0x102   : > { %1159 = vmatmul.msk.bf16.gmra.mxu1 %vm307_vm1, %v692_v44 }
 0x107   : > { %v1392_v49 = vpop.f32.mrf.mxu1 }
 0x108   : > { %1169 = vmatmul.msk.bf16.gmra.mxu3 %vm307_vm1, %v429_v32 }
 0x109   : > { %1164 = vmatmul.msk.bf16.gmra.mxu2 %vm307_vm1, %v1340_v62 }
 0x111   : > { %1174 = vmatmul.msk.bf16.gmra.mxu0 %vm307_vm1, %v495_v38 }
 0x112   : > { %1160 = vmatmul.msk.bf16.gmra.mxu1 %vm307_vm1, %v693_v46 }
 0x118   : > { %1170 = vmatmul.msk.bf16.gmra.mxu3 %vm307_vm1, %v826_v50 }
 0x119   : > { %1165 = vmatmul.msk.bf16.gmra.mxu2 %vm307_vm1, %v760_v51 }
 0x11b   : > { %v1396_v52 = vpop.f32.mrf.mxu3 }
 0x11c   : > { %v1398_v53 = vpop.f32.mrf.mxu2 }
 0x11e   : > { %v390_v55 = vpop.f32.mrf.mxu0 }
 0x11f   : > { %v456_v56 = vpop.f32.mrf.mxu1  ;;  %v410_v23 = vadd.f32 %v390_v55, %v344_v22 }
 0x121   : > { %1175 = vmatmul.msk.bf16.gmra.mxu0 %vm307_vm1, %v892_v57  ;;  %v476_v28 = vadd.f32 %v456_v56, %v410_v23 }
 0x123   : > { %v1401_v58 = vpop.f32.mrf.mxu3 }
 0x124   : > { %v1403_v59 = vpop.f32.mrf.mxu2 }
 0x126   : > { %v392_v60 = vpop.f32.mrf.mxu0 }
 0x127   : > { %v458_v61 = vpop.f32.mrf.mxu1  ;;  %v411_v31 = vadd.f32 %v392_v60, %v345_v29 }
 0x129   : > { %v477_v37 = vadd.f32 %v458_v61, %v411_v31 }
 0x12b   : > { %v588_v62 = vpop.f32.mrf.mxu3 }
 0x12c   : > { %v522_v63 = vpop.f32.mrf.mxu2 }
 0x12d   : > { %v542_v30 = vadd.f32 %v522_v63, %v476_v28  ;;  %v413_v63 = vadd.f32 %v1392_v49, %v347_v39  ;;  %v348_v28 = vld [vmem:[%s1562_s2 + $0x20] sm:$0xff] }
 0x12e   : > { %v654_v1 = vpop.f32.mrf.mxu0 }
 0x12f   : > { %v461_v0 = vpop.f32.mrf.mxu1  ;;  %v608_v34 = vadd.f32 %v588_v62, %v542_v30  ;;  %v414_v30 = vadd.f32 %v1398_v53, %v348_v28 }
 0x130   : > { %v478_v51 = vadd.f32 %v461_v0, %v412_v45 }
 0x131   : > { %v674_v38 = vadd.f32 %v654_v1, %v608_v34 }
 0x133   : > { %v590_v2 = vpop.f32.mrf.mxu3 }
 0x134   : > { %v524_v3 = vpop.f32.mrf.mxu2 }
 0x135   : > { %v543_v40 = vadd.f32 %v524_v3, %v477_v37 }
 0x136   : > { %v656_v5 = vpop.f32.mrf.mxu0 }
 0x137   : > { %v463_v4 = vpop.f32.mrf.mxu1  ;;  %v609_v46 = vadd.f32 %v590_v2, %v543_v40  ;;  %v349_v40 = vld [vmem:[%s1562_s2 + $0x28] sm:$0xff] }
 0x138   : > { %v479_v3 = vadd.f32 %v463_v4, %v413_v63 }
 0x139   : > { %v675_v55 = vadd.f32 %v656_v5, %v609_v46 }
 0x13b   : > { %v593_v6 = vpop.f32.mrf.mxu3 }
 0x13c   : > { %v527_v7 = vpop.f32.mrf.mxu2 }
 0x13d   : > { %v544_v56 = vadd.f32 %v527_v7, %v478_v51 }
 0x13e   : > { %v659_v9 = vpop.f32.mrf.mxu0 }
 0x13f   : > { %v1405_v8 = vpop.f32.mrf.mxu1  ;;  %v610_v0 = vadd.f32 %v593_v6, %v544_v56 }
 0x141   : > { %v676_v22 = vadd.f32 %v659_v9, %v610_v0 }
 0x143   : > { %v1407_v10 = vpop.f32.mrf.mxu3 }
 0x144   : > { %v529_v11 = vpop.f32.mrf.mxu2 }
 0x145   : > { %v545_v23 = vadd.f32 %v529_v11, %v479_v3  ;;  %v480_v11 = vadd.f32 %v1405_v8, %v414_v30  ;;  %v415_v8 = vadd.f32 %v1403_v59, %v349_v40 }
 0x146   : > { %v1411_v13 = vpop.f32.mrf.mxu0 }
 0x147   : > { %v1409_v12 = vpop.f32.mrf.mxu1  ;;  %v611_v4 = vadd.f32 %v1407_v10, %v545_v23 }
 0x148   : > { %v481_v45 = vadd.f32 %v1409_v12, %v415_v8 }
 0x14b   : > { %v1413_v14 = vpop.f32.mrf.mxu3 }
 0x14c   : > { %v1415_v15 = vpop.f32.mrf.mxu2 }
 0x14d   : > { %v546_v37 = vadd.f32 %v1415_v15, %v480_v11 }
 0x14e   : > { %v1419_v17 = vpop.f32.mrf.mxu0 }
 0x14f   : > { %v1417_v16 = vpop.f32.mrf.mxu1 }
 0x153   : > { %v1421_v18 = vpop.f32.mrf.mxu3 }
 0x154   : > { %v1423_v19 = vpop.f32.mrf.mxu2 }
 0x155   : > { %v547_v51 = vadd.f32 %v1423_v19, %v481_v45 }
 0x156   : > { %v1427_v21 = vpop.f32.mrf.mxu0 }
 0x157   : > { %v1425_v20 = vpop.f32.mrf.mxu1 }
 0x15b   : > { %v1432_v24 = vpop.f32.mrf.mxu3 }
 0x15c   : > { %v1434_v25 = vpop.f32.mrf.mxu2 }
 0x15e   : > { %v1436_v26 = vpop.f32.mrf.mxu0 }
 0x15f   : > { %v720_v27 = vpop.f32.mrf.mxu1 }
 0x160   : > { %v740_v42 = vadd.f32 %v720_v27, %v674_v38 }
 0x163   : > { %v1441_v32 = vpop.f32.mrf.mxu3 }
 0x164   : > { %v1443_v33 = vpop.f32.mrf.mxu2 }
 0x166   : > { %v1445_v35 = vpop.f32.mrf.mxu0 }
 0x167   : > { %v722_v36 = vpop.f32.mrf.mxu1 }
 0x168   : > { %v741_v60 = vadd.f32 %v722_v36, %v675_v55  ;;  %v677_v36 = vadd.f32 %v1411_v13, %v611_v4  ;;  %v612_v13 = vadd.f32 %v1413_v14, %v546_v37 }
 0x16a   : > { %v678_v59 = vadd.f32 %v1419_v17, %v612_v13 }
 0x16b   : > { %v853_v43 = vpop.f32.mrf.mxu3 }
 0x16c   : > { %v787_v44 = vpop.f32.mrf.mxu2 }
 0x16d   : > { %v807_v47 = vadd.f32 %v787_v44, %v740_v42 }
 0x16e   : > { %v919_v50 = vpop.f32.mrf.mxu0 }
 0x16f   : > { %v725_v48 = vpop.f32.mrf.mxu1  ;;  %v873_v54 = vadd.f32 %v853_v43, %v807_v47 }
 0x170   : > { %v742_v29 = vadd.f32 %v725_v48, %v676_v22  ;;  %v351_v22 = vld [vmem:[%s1562_s2 + $0x38] sm:$0xff] }
 0x171   : > { %v1457_v57 = vadd.f32 %v919_v50, %v873_v54  ;;  %v350_v54 = vld [vmem:[%s1562_s2 + $0x30] sm:$0xff] }
 0x172   : > { %v416_v19 = vadd.f32 %v1396_v52, %v350_v54 }
 0x173   : > { %948 = vst.msk [vmem:[%s1455_s29] sm:$0xff] %vm947_vm4, %v1457_v57  ;;  %v855_v61 = vpop.f32.mrf.mxu3  ;;  %v956_v46 = vsel %vm947_vm4, %v1457_v57, 0.0 }
 0x174   : > { %v789_v62 = vpop.f32.mrf.mxu2 }
 0x175   : > { %v808_v1 = vadd.f32 %v789_v62, %v741_v60  ;;  %v613_v62 = vadd.f32 %v1421_v18, %v547_v51 }
 0x176   : > { %v921_v2 = vpop.f32.mrf.mxu0 }
 0x177   : > { %v874_v5 = vadd.f32 %v855_v61, %v808_v1  ;;  %v727_v7 = vpop.f32.mrf.mxu1  ;;  %v482_v1 = vadd.f32 %v1417_v16, %v416_v19  ;;  %v679_v3 = vadd.f32 %v1427_v21, %v613_v62  ;;  %v417_v16 = vadd.f32 %v1401_v58, %v351_v22 }
 0x178   : > { %v743_v42 = vadd.f32 %v727_v7, %v677_v36 }
 0x179   : > { %v1466_v27 = vadd.f32 %v921_v2, %v874_v5  ;;  %v548_v5 = vadd.f32 %v1434_v25, %v482_v1  ;;  %v483_v30 = vadd.f32 %v1425_v20, %v417_v16 }
 0x17b   : > { %949 = vst.msk [vmem:[%s1455_s29 + $0x8] sm:$0xff] %vm947_vm4, %v1466_v27  ;;  %v858_v49 = vpop.f32.mrf.mxu3  ;;  %v957_v15 = vsel %vm947_vm4, %v1466_v27, 0.0  ;;  %v614_v21 = vadd.f32 %v1432_v24, %v548_v5 }
 0x17c   : > { %v792_v6 = vpop.f32.mrf.mxu2  ;;  %v958_v50 = vadd.f32 %v957_v15, %v956_v46 }
 0x17d   : > { %v809_v31 = vadd.f32 %v792_v6, %v742_v29 }
 0x17e   : > { %v924_v9 = vpop.f32.mrf.mxu0 }
 0x17f   : > { %v875_v34 = vadd.f32 %v858_v49, %v809_v31  ;;  %v730_v41 = vpop.f32.mrf.mxu1  ;;  %v680_v31 = vadd.f32 %v1436_v26, %v614_v21 }
 0x180   : > { %v744_v12 = vadd.f32 %v730_v41, %v678_v59 }
 0x181   : > { %v1479_v38 = vadd.f32 %v924_v9, %v875_v34  ;;  %v549_v9 = vadd.f32 %v1443_v33, %v483_v30 }
 0x183   : > { %950 = vst.msk [vmem:[%s1455_s29 + $0x10] sm:$0xff] %vm947_vm4, %v1479_v38  ;;  %v860_v53 = vpop.f32.mrf.mxu3  ;;  %v959_v47 = vsel %vm947_vm4, %v1479_v38, 0.0  ;;  %v615_v40 = vadd.f32 %v1441_v32, %v549_v9 }
 0x184   : > { %v794_v10 = vpop.f32.mrf.mxu2  ;;  %v960_v55 = vadd.f32 %v959_v47, %v958_v50 }
 0x185   : > { %v810_v43 = vadd.f32 %v794_v10, %v743_v42  ;;  %v681_v26 = vadd.f32 %v1445_v35, %v615_v40 }
 0x186   : > { %v926_v44 = vpop.f32.mrf.mxu0 }
 0x187   : > { %v876_v48 = vadd.f32 %v860_v53, %v810_v43  ;;  %v732_v60 = vpop.f32.mrf.mxu1 }
 0x188   : > { %v745_v23 = vadd.f32 %v732_v60, %v679_v3 }
 0x189   : > { %v1498_v14 = vadd.f32 %v926_v44, %v876_v48 }
 0x18b   : > { %951 = vst.msk [vmem:[%s1455_s29 + $0x18] sm:$0xff] %vm947_vm4, %v1498_v14  ;;  %v961_v56 = vsel %vm947_vm4, %v1498_v14, 0.0  ;;  %v863_v39 = vpop.f32.mrf.mxu3 }
 0x18c   : > { %v962_v17 = vadd.f32 %v961_v56, %v960_v55  ;;  %v797_v61 = vpop.f32.mrf.mxu2 }
 0x18d   : > { %v811_v63 = vadd.f32 %v797_v61, %v744_v12 }
 0x18e   : > { %v929_v0 = vpop.f32.mrf.mxu0 }
 0x18f   : > { %v877_v2 = vadd.f32 %v863_v39, %v811_v63  ;;  %v735_v25 = vpop.f32.mrf.mxu1 }
 0x190   : > { %v746_v34 = vadd.f32 %v735_v25, %v680_v31 }
 0x191   : > { %v943_v7 = vadd.f32 %v929_v0, %v877_v2 }
 0x193   : > { %952 = vst.msk [vmem:[%s1455_s29 + $0x20] sm:$0xff] %vm947_vm4, %v943_v7  ;;  %v963_v52 = vsel %vm947_vm4, %v943_v7, 0.0  ;;  %v865_v18 = vpop.f32.mrf.mxu3 }
 0x194   : > { %v964_v28 = vadd.f32 %v963_v52, %v962_v17  ;;  %v799_v29 = vpop.f32.mrf.mxu2 }
 0x195   : > { %v812_v49 = vadd.f32 %v799_v29, %v745_v23 }
 0x196   : > { %v931_v6 = vpop.f32.mrf.mxu0 }
 0x197   : > { %v878_v4 = vadd.f32 %v865_v18, %v812_v49  ;;  %v737_v53 = vpop.f32.mrf.mxu1 }
 0x198   : > { %v747_v10 = vadd.f32 %v737_v53, %v681_v26 }
 0x199   : > { %v944_v11 = vadd.f32 %v931_v6, %v878_v4 }
 0x19b   : > { %953 = vst.msk [vmem:[%s1455_s29 + $0x28] sm:$0xff] %vm947_vm4, %v944_v11  ;;  %v965_v36 = vsel %vm947_vm4, %v944_v11, 0.0  ;;  %v868_v24 = vpop.f32.mrf.mxu3 }
 0x19c   : > { %v966_v58 = vadd.f32 %v965_v36, %v964_v28  ;;  %v802_v37 = vpop.f32.mrf.mxu2 }
 0x19d   : > { %v813_v41 = vadd.f32 %v802_v37, %v746_v34 }
 0x19e   : > { %v934_v20 = vpop.f32.mrf.mxu0 }
 0x19f   : > { %v879_v42 = vadd.f32 %v868_v24, %v813_v41 }
 0x1a1   : > { %v945_v33 = vadd.f32 %v934_v20, %v879_v42 }
 0x1a3   : > { %954 = vst.msk [vmem:[%s1455_s29 + $0x30] sm:$0xff] %vm947_vm4, %v945_v33  ;;  %v967_v8 = vsel %vm947_vm4, %v945_v33, 0.0  ;;  %v870_v44 = vpop.f32.mrf.mxu3 }
 0x1a4   : > { %v968_v13 = vadd.f32 %v967_v8, %v966_v58  ;;  %v804_v15 = vpop.f32.mrf.mxu2 }
 0x1a5   : > { %v814_v43 = vadd.f32 %v804_v15, %v747_v10 }
 0x1a6   : > { %v936_v32 = vpop.f32.mrf.mxu0 }
 0x1a7   : > { %v880_v45 = vadd.f32 %v870_v44, %v814_v43 }
 0x1a9   : > { %v946_v46 = vadd.f32 %v936_v32, %v880_v45 }
 0x1ab   : > { %955 = vst.msk [vmem:[%s1455_s29 + $0x38] sm:$0xff] %vm947_vm4, %v946_v46  ;;  %v969_v47 = vsel %vm947_vm4, %v946_v46, 0.0 }
 0x1ac   : > { %v970_v48 = vadd.f32 %v969_v47, %v968_v13 }
 0x1ae   : > { %v971_v35 = vrot.slane %v970_v48, 4 }
 0x1b0   : > { %v972_v50 = vadd.f32 %v971_v35, %v970_v48 }
 0x1b2   : > { %v973_v59 = vrot.slane %v972_v50, 2 }
 0x1b4   : > { %v974_v51 = vadd.f32 %v973_v59, %v972_v50 }
 0x1b6   : > { %v975_v54 = vrot.slane %v974_v51, 1 }
 0x1b8   : > { %v976_v55 = vadd.f32 %v975_v54, %v974_v51 }
 0x1ba   : > { %v977_v12 = vmul.f32 0.015625, %v976_v55  ;;  %987 = vst.msk [vmem:[%s238_s17] sm:$0x1] %vm986_vm5, %v976_v55 }
 0x1bc   : > { %v978_v56 = vsub.f32 %v1457_v57, %v977_v12  ;;  %v979_v39 = vsub.f32 %v1466_v27, %v977_v12  ;;  %v980_v60 = vsub.f32 %v1479_v38, %v977_v12  ;;  %v981_v17 = vsub.f32 %v1498_v14, %v977_v12 }
 0x1bd   : > { %v982_v61 = vsub.f32 %v943_v7, %v977_v12  ;;  %v983_v19 = vsub.f32 %v944_v11, %v977_v12  ;;  %v984_v62 = vsub.f32 %v945_v33, %v977_v12  ;;  %v985_v63 = vsub.f32 %v946_v46, %v977_v12 }
 0x1be   : > { %v988_v0 = vmul.f32 %v978_v56, %v978_v56  ;;  %v989_v1 = vmul.f32 %v979_v39, %v979_v39  ;;  %v990_v2 = vmul.f32 %v980_v60, %v980_v60  ;;  %v991_v3 = vmul.f32 %v981_v17, %v981_v17 }
 0x1bf   : > { %v992_v57 = vmul.f32 %v982_v61, %v982_v61  ;;  %v993_v38 = vmul.f32 %v983_v19, %v983_v19  ;;  %v994_v18 = vmul.f32 %v984_v62, %v984_v62  ;;  %v995_v16 = vmul.f32 %v985_v63, %v985_v63 }
 0x1c0   : > { %v996_v5 = vsel %vm947_vm4, %v988_v0, 0.0  ;;  %v997_v22 = vsel %vm947_vm4, %v989_v1, 0.0  ;;  %v999_v27 = vsel %vm947_vm4, %v990_v2, 0.0  ;;  %v1001_v14 = vsel %vm947_vm4, %v991_v3, 0.0 }
 0x1c1   : > { %v998_v23 = vadd.f32 %v997_v22, %v996_v5  ;;  %v1003_v28 = vsel %vm947_vm4, %v992_v57, 0.0  ;;  %v1005_v21 = vsel %vm947_vm4, %v993_v38, 0.0  ;;  %v1007_v25 = vsel %vm947_vm4, %v994_v18, 0.0 }
 0x1c2   : > { %v1009_v30 = vsel %vm947_vm4, %v995_v16, 0.0 }
 0x1c3   : > { %v1000_v52 = vadd.f32 %v999_v27, %v998_v23 }
 0x1c5   : > { %v1002_v7 = vadd.f32 %v1001_v14, %v1000_v52 }
 0x1c7   : > { %v1004_v29 = vadd.f32 %v1003_v28, %v1002_v7 }
 0x1c9   : > { %v1006_v49 = vadd.f32 %v1005_v21, %v1004_v29 }
 0x1cb   : > { %v1008_v6 = vadd.f32 %v1007_v25, %v1006_v49 }
 0x1cd   : > { %v1010_v4 = vadd.f32 %v1009_v30, %v1008_v6 }
 0x1cf   : > { %v1011_v31 = vrot.slane %v1010_v4, 4 }
 0x1d1   : > { %v1012_v9 = vadd.f32 %v1011_v31, %v1010_v4 }
 0x1d3   : > { %v1013_v11 = vrot.slane %v1012_v9, 2 }
 0x1d5   : > { %v1014_v34 = vadd.f32 %v1013_v11, %v1012_v9 }
 0x1d7   : > { %v1015_v36 = vrot.slane %v1014_v34, 1 }
 0x1d9   : > { %v1016_v58 = vadd.f32 %v1015_v36, %v1014_v34 }
 0x1db   : > { %1017 = vst.msk [vmem:[%s241_s22] sm:$0x1] %vm986_vm5, %v1016_v58 }
 0x1dc PF: > { %s16_s18 = sadd.s32 1, %s1199_s18  }
 0x1dd   : > { %p13_p4 = scmp.ge.s32.totalorder %s16_s18, 4  }
 0x1df   :  { %15 = sbr.rel (!%p13_p4) target bundleno = 1 (0x1), region = 97 }

// kernel: down_forward.4
= control target key start
LH: loop header
LB: loop body
LE: loop exit
PB: predicated region body
PF: predicated region fallthrough
CT: control target
= control target key end

     0   :  { %s1271_s24 = smov 0   ;;  %s1645_s0 = inlined_call_operand.vmem [shape: f32[2,64,8], index: 0, kind: input, shape index: {}]   ;;  %s1646_s1 = inlined_call_operand.vmem [shape: f32[1,8], index: 1, kind: input, shape index: {}]   ;;  %s1647_s2 = inlined_call_operand.vmem [shape: f32[1,8], index: 2, kind: input, shape index: {}]   ;;  %s1648_s3 = inlined_call_operand.vmem [shape: bf16[9,8,8], index: 3, kind: input, shape index: {}]   ;;  %s1649_s4 = inlined_call_operand.vmem [shape: f32[64,8], index: 4, kind: input, shape index: {}]   ;;  %s1650_s5 = inlined_call_operand.vmem [shape: f32[2,64,8], index: 5, kind: output, shape index: {0}]   ;;  %s1651_s6 = inlined_call_operand.vmem [shape: f32[2,1,8], index: 6, kind: output, shape index: {1}]   ;;  %s1652_s7 = inlined_call_operand.vmem [shape: f32[2,1,8], index: 7, kind: output, shape index: {2}]  }
   0x1 LB: > { %s1151_s25 = sadd.s32 4294967295, %s1228_s24   ;;  %p1155_p0 = scmp.ge.s32.totalorder %s1228_s24, 1  ;;  %s1228_s24 = sphi %s1271_s24, %s18_s24  }
   0x2   : > { %p242_p1 = scmp.lt.s32.totalorder %s1228_s24, 3 }
   0x4   : > { %p243_p2 = pnand %p1155_p0, %p242_p1 }
   0x5   : > { %p280_p3 = scmp.lt.s32.totalorder (!%p243_p2), %s1151_s25, 1 }
   0x6   : > { %246 = sbr.rel (%p243_p2) target bundleno = 369 (0x171), region = 40 }
   0xb   : > { %v394_v0 = vld [vmem:[%s1648_s3] sm:$0xf]  ;;  %vm407_vm0 = vcmask 1043456   ;;  %s1654_s25 = smov (!%p280_p3, %s1151_s25), 1  ;;  %vm337_vm1 = vcmask 64512   ;;  %vm344_vm2 = vcmask 57344  }
   0xc   : > { %v409_v1 = vsel %vm407_vm0, %v394_v0, 0  ;;  %v1288_v2 = vld [vmem:[%s1646_s1] ss:$0 sm:$0xff]  ;;  %v1230_v3 = vmov 0.0   ;;  %s1206_s30 = sshll.u32 %s1654_s25, 6  ;;  %vm339_vm3 = vcmask 58368   ;;  %s292_s9 = scalar_lea.vmem %s1651_s6, %s1654_s25 }
   0xd   : > { %1208 = vmatpush.bf16.msra.mxu1 %v409_v1  ;;  %1209 = vmatpush.bf16.msra.mxu2 %v409_v1  ;;  %347 = vst.msk [vmem:[#allocation2 + $0x20] sm:$0x1] %vm344_vm2, %v1230_v3  ;;  %s1300_s10 = scalar_lea.vmem %s1645_s0, %s1206_s30  ;;  %v1305_v4 = vld [vmem:[%s1647_s2] ss:$0 sm:$0xff]  ;;  %v1169_v10 = vld [vmem:[%s1648_s3 + $0x8] sm:$0xf]  ;;  %s1543_s19 = scalar_lea.vmem %s1650_s5, %s1206_s30 }
   0xe   : > { %1210 = vmatpush.bf16.msra.mxu3 %v409_v1  ;;  %418 = vmatpush.bf16.msra.mxu0 %v409_v1  ;;  %348 = vst.msk [vmem:[#allocation2 + $0x30] sm:$0x1] %vm344_vm2, %v1230_v3  ;;  %v298_v5 = vld [vmem:[%s1300_s10 + $0x8] sm:$0xff]  ;;  %v299_v6 = vld [vmem:[%s1300_s10 + $0x10] sm:$0xff]  ;;  %v300_v9 = vld [vmem:[%s1300_s10 + $0x18] sm:$0xff]  ;;  %v541_v14 = vsel %vm407_vm0, %v1169_v10, 0  ;;  %s295_s12 = scalar_lea.vmem %s1652_s7, %s1654_s25 }
   0xf   : > { %338 = vst.msk [vmem:[#allocation2] sm:$0xff] %vm337_vm1, %v1230_v3  ;;  %v310_v7 = vmul.f32 %v1288_v2, %v298_v5  ;;  %v311_v8 = vmul.f32 %v1288_v2, %v299_v6  ;;  %v301_v13 = vld [vmem:[%s1300_s10 + $0x20] sm:$0xff]  ;;  %v1174_v15 = vld [vmem:[%s1648_s3 + $0xc] sm:$0xf]  ;;  %v312_v20 = vmul.f32 %v1288_v2, %v300_v9  ;;  %v303_v24 = vld [vmem:[%s1300_s10 + $0x30] sm:$0xff] }
  0x10   : > { %342 = vst.msk [vmem:[#allocation2 + $0x90] sm:$0xff] %vm337_vm1, %v1230_v3  ;;  %v607_v16 = vsel %vm407_vm0, %v1174_v15, 0  ;;  %v1164_v17 = vld [vmem:[%s1648_s3 + $0x4] sm:$0xf]  ;;  %v313_v21 = vmul.f32 %v1288_v2, %v301_v13  ;;  %v302_v22 = vld [vmem:[%s1300_s10 + $0x28] sm:$0xff]  ;;  %v315_v31 = vmul.f32 %v1288_v2, %v303_v24  ;;  %v304_v10 = vld [vmem:[%s1300_s10 + $0x38] sm:$0xff] }
  0x11   : > { %346 = vst.msk [vmem:[#allocation2 + $0x10] sm:$0x1] %vm344_vm2, %v1230_v3  ;;  %v322_v11 = vadd.f32 %v1305_v4, %v310_v7  ;;  %v323_v12 = vadd.f32 %v1305_v4, %v311_v8  ;;  %550 = vmatpush.bf16.msrb.mxu2 %v541_v14  ;;  %v475_v23 = vsel %vm407_vm0, %v1164_v17, 0  ;;  %v1179_v25 = vld [vmem:[%s1648_s3 + $0x10] sm:$0xf]  ;;  %v297_v26 = vld [vmem:[%s1300_s10] sm:$0xff]  ;;  %v324_v28 = vadd.f32 %v1305_v4, %v312_v20 }
  0x12   : > { %349 = vst.msk [vmem:[#allocation2 + $0x40] sm:$0x1] %vm344_vm2, %v1230_v3  ;;  %616 = vmatpush.bf16.msrb.mxu3 %v607_v16  ;;  %484 = vmatpush.bf16.msrb.mxu1 %v475_v23  ;;  %v673_v27 = vsel %vm407_vm0, %v1179_v25, 0  ;;  %v314_v29 = vmul.f32 %v1288_v2, %v302_v22  ;;  %v325_v30 = vadd.f32 %v1305_v4, %v313_v21  ;;  %v1184_v42 = vld [vmem:[%s1648_s3 + $0x14] sm:$0xf] }
  0x13   : > { %350 = vst.msk [vmem:[#allocation2 + $0x50] sm:$0x1] %vm344_vm2, %v1230_v3  ;;  %v330_v18 = vmax.f32 %v322_v11, 0.0  ;;  %v331_v19 = vmax.f32 %v323_v12, 0.0  ;;  %682 = vmatpush.bf16.msrb.mxu0 %v673_v27  ;;  %v309_v32 = vmul.f32 %v1288_v2, %v297_v26  ;;  %v332_v33 = vmax.f32 %v324_v28, 0.0 }
  0x14   : > { %351 = vst.msk [vmem:[#allocation2 + $0x60] sm:$0x1] %vm344_vm2, %v1230_v3  ;;  %v326_v34 = vadd.f32 %v1305_v4, %v314_v29  ;;  %v333_v36 = vmax.f32 %v325_v30, 0.0  ;;  %v327_v37 = vadd.f32 %v1305_v4, %v315_v31  ;;  %v739_v44 = vsel %vm407_vm0, %v1184_v42, 0  ;;  %v1189_v46 = vld [vmem:[%s1648_s3 + $0x18] sm:$0xf] }
  0x15   : > { %352 = vst.msk [vmem:[#allocation2 + $0x70] sm:$0x1] %vm344_vm2, %v1230_v3  ;;  %v321_v39 = vadd.f32 %v1305_v4, %v309_v32  ;;  %v806_v50 = vsel %vm407_vm0, %v1189_v46, 0  ;;  %v1194_v51 = vld [vmem:[%s1648_s3 + $0x1c] sm:$0xf]  ;;  %v316_v11 = vmul.f32 %v1288_v2, %v304_v10 }
  0x16   : > { %353 = vst.msk [vmem:[#allocation2 + $0x80] sm:$0x1] %vm344_vm2, %v1230_v3  ;;  %v334_v41 = vmax.f32 %v326_v34, 0.0  ;;  %v335_v43 = vmax.f32 %v327_v37, 0.0  ;;  %v1199_v54 = vld [vmem:[%s1648_s3 + $0x20] sm:$0xf] }
  0x17   : > { %367 = vst.msk [vmem:[#allocation2 + $0x21] sm:$0xff] %vm337_vm1, %v330_v18  ;;  %v329_v45 = vmax.f32 %v321_v39, 0.0  ;;  %v872_v59 = vsel %vm407_vm0, %v1194_v51, 0  ;;  %v938_v62 = vsel %vm407_vm0, %v1199_v54, 0  ;;  %v328_v12 = vadd.f32 %v1305_v4, %v316_v11 }
  0x18   : > { %368 = vst.msk [vmem:[#allocation2 + $0x31] sm:$0xff] %vm337_vm1, %v331_v19 }
  0x19   : > { %356 = vst.msk [vmem:[#allocation2 + $0x19] sm:$0x1] %vm344_vm2, %v1230_v3  ;;  %v336_v13 = vmax.f32 %v328_v12, 0.0 }
  0x1a   : > { %357 = vst.msk [vmem:[#allocation2 + $0x29] sm:$0x1] %vm344_vm2, %v1230_v3 }
  0x1b   : > { %358 = vst.msk [vmem:[#allocation2 + $0x39] sm:$0x1] %vm344_vm2, %v1230_v3 }
  0x1c   : > { %359 = vst.msk [vmem:[#allocation2 + $0x49] sm:$0x1] %vm344_vm2, %v1230_v3 }
  0x1d   : > { %360 = vst.msk [vmem:[#allocation2 + $0x59] sm:$0x1] %vm344_vm2, %v1230_v3 }
  0x1e   : > { %v1370_v35 = vld [vmem:[#allocation2 + $0x20] sm:$0xff]  ;;  %361 = vst.msk [vmem:[#allocation2 + $0x69] sm:$0x1] %vm344_vm2, %v1230_v3 }
  0x1f   : > { %v1375_v38 = vld [vmem:[#allocation2 + $0x30] sm:$0xff]  ;;  %362 = vst.msk [vmem:[#allocation2 + $0x79] sm:$0x1] %vm344_vm2, %v1230_v3  ;;  %v647_v5 = vld [vmem:[#allocation2 + $0x21] sm:$0xff] }
  0x20   : > { %v1382_v40 = vpack.c.bf16 %v1375_v38, %v1370_v35  ;;  %363 = vst.msk [vmem:[#allocation2 + $0x89] sm:$0x1] %vm344_vm2, %v1230_v3  ;;  %v451_v6 = vld [vmem:[#allocation2 + $0x31] sm:$0xff] }
  0x21   : > { %369 = vst.msk [vmem:[#allocation2 + $0x41] sm:$0xff] %vm337_vm1, %v332_v33  ;;  %v457_v9 = vpack.c.bf16 %v451_v6, %v647_v5  ;;  %v516_v14 = vld [vmem:[#allocation2 + $0x22] sm:$0xff] }
  0x22   : > { %1161 = vmatmul.msk.bf16.vlgmr.msra.gmra.mxu1 %vm337_vm1, %v1382_v40  ;;  %370 = vst.msk [vmem:[#allocation2 + $0x51] sm:$0xff] %vm337_vm1, %v333_v36  ;;  %v517_v15 = vld [vmem:[#allocation2 + $0x32] sm:$0xff] }
  0x23   : > { %345 = vst.msk [vmem:[#allocation2] sm:$0x1] %vm344_vm2, %v1230_v3  ;;  %748 = vmatpush.bf16.msra.mxu1 %v739_v44  ;;  %v523_v16 = vpack.c.bf16 %v517_v15, %v516_v14 }
  0x24   : > { %354 = vst.msk [vmem:[#allocation2 + $0x90] sm:$0x1] %vm344_vm2, %v1230_v3 }
  0x25   : > { %371 = vst.msk [vmem:[#allocation2 + $0x61] sm:$0xff] %vm337_vm1, %v334_v41 }
  0x26   : > { %372 = vst.msk [vmem:[#allocation2 + $0x71] sm:$0xff] %vm337_vm1, %v335_v43 }
  0x27   : > { %366 = vst.msk [vmem:[#allocation2 + $0x11] sm:$0xff] %vm337_vm1, %v329_v45 }
  0x28   : > { %v386_v47 = vld [vmem:[#allocation2 + $0x40] sm:$0xff]  ;;  %340 = vst.msk [vmem:[#allocation2 + $0x8] sm:$0x3] %vm339_vm3, %v1230_v3 }
  0x29   : > { %v1405_v48 = vld [vmem:[#allocation2 + $0x50] sm:$0xff]  ;;  %343 = vst.msk [vmem:[#allocation2 + $0x98] sm:$0x3] %vm339_vm3, %v1230_v3  ;;  %v649_v17 = vld [vmem:[#allocation2 + $0x41] sm:$0xff]  ;;  %v589_v19 = vpack.c.bf16 %v386_v47, %v1375_v38 }
  0x2a   : > { %v1409_v49 = vpack.c.bf16 %v1405_v48, %v386_v47  ;;  %355 = vst.msk [vmem:[#allocation2 + $0x9] sm:$0x1] %vm344_vm2, %v1230_v3  ;;  %v382_v53 = vld [vmem:[#allocation2] sm:$0xff]  ;;  %v453_v18 = vld [vmem:[#allocation2 + $0x51] sm:$0xff]  ;;  %v655_v20 = vpack.c.bf16 %v649_v17, %v451_v6 }
  0x2b   : > { %364 = vst.msk [vmem:[#allocation2 + $0x99] sm:$0x1] %vm344_vm2, %v1230_v3  ;;  %v458_v2 = vpack.c.bf16 %v453_v18, %v649_v17  ;;  %v518_v4 = vld [vmem:[#allocation2 + $0x42] sm:$0xff]  ;;  %v519_v21 = vld [vmem:[#allocation2 + $0x52] sm:$0xff] }
  0x2c   : > { %1162 = vmatmul.msk.bf16.vlgmr.msra.gmra.mxu2 %vm337_vm1, %v1409_v49  ;;  %v388_v52 = vld [vmem:[#allocation2 + $0x60] sm:$0xff]  ;;  %373 = vst.msk [vmem:[#allocation2 + $0x81] sm:$0xff] %vm337_vm1, %v336_v13  ;;  %v524_v22 = vpack.c.bf16 %v519_v21, %v518_v4  ;;  %v721_v36 = vpack.c.bf16 %v518_v4, %v517_v15  ;;  %v786_v41 = vld [vmem:[#allocation2 + $0x90] sm:$0xff] }
  0x2d   : > { %v1424_v55 = vld [vmem:[#allocation2 + $0x70] sm:$0xff]  ;;  %815 = vmatpush.bf16.msra.mxu2 %v806_v50  ;;  %v651_v23 = vld [vmem:[#allocation2 + $0x61] sm:$0xff]  ;;  %v590_v25 = vpack.c.bf16 %v388_v52, %v1405_v48 }
  0x2e   : > { %v1427_v56 = vpack.c.bf16 %v1424_v55, %v388_v52  ;;  %v383_v57 = vld [vmem:[#allocation2 + $0x10] sm:$0xff]  ;;  %v656_v26 = vpack.c.bf16 %v651_v23, %v453_v18  ;;  %v520_v28 = vld [vmem:[#allocation2 + $0x62] sm:$0xff] }
  0x2f   : > { %v449_v58 = vld [vmem:[#allocation2 + $0x11] sm:$0xff]  ;;  %v390_v60 = vpack.c.bf16 %v383_v57, %v382_v53  ;;  %v448_v61 = vld [vmem:[#allocation2 + $0x1] sm:$0xff]  ;;  %v588_v7 = vpack.c.bf16 %v1370_v35, %v383_v57  ;;  %v722_v37 = vpack.c.bf16 %v520_v28, %v519_v21 }
  0x30   : > { %1163 = vmatmul.msk.bf16.vlgmr.msra.gmra.mxu3 %vm337_vm1, %v1427_v56  ;;  %v456_v63 = vpack.c.bf16 %v449_v58, %v448_v61  ;;  %v515_v1 = vld [vmem:[#allocation2 + $0x12] sm:$0xff]  ;;  %v654_v8 = vpack.c.bf16 %v647_v5, %v449_v58  ;;  %v374_v18 = vld [vmem:[%s1649_s4] sm:$0xff] }
  0x31   : > { %1160 = vmatmul.msk.bf16.vlgmr.msra.gmra.mxu0 %vm337_vm1, %v390_v60  ;;  %881 = vmatpush.bf16.msra.mxu3 %v872_v59  ;;  %v514_v0 = vld [vmem:[#allocation2 + $0x2] sm:$0xff]  ;;  %v455_v24 = vld [vmem:[#allocation2 + $0x71] sm:$0xff]  ;;  %v720_v35 = vpack.c.bf16 %v516_v14, %v515_v1 }
  0x32   : > { %1165 = vmatmul.msk.bf16.vlgmr.msrb.gmra.mxu1 %vm337_vm1, %v456_v63  ;;  %947 = vmatpush.bf16.msra.mxu0 %v938_v62  ;;  %v522_v3 = vpack.c.bf16 %v515_v1, %v514_v0  ;;  %v459_v27 = vpack.c.bf16 %v455_v24, %v651_v23  ;;  %v521_v29 = vld [vmem:[#allocation2 + $0x72] sm:$0xff] }
  0x33   : > { %v525_v30 = vpack.c.bf16 %v521_v29, %v520_v28  ;;  %v587_v31 = vld [vmem:[#allocation2 + $0x80] sm:$0xff]  ;;  %v852_v44 = vld [vmem:[#allocation2 + $0x91] sm:$0xff] }
  0x34   : > { %v653_v32 = vld [vmem:[#allocation2 + $0x81] sm:$0xff]  ;;  %v591_v33 = vpack.c.bf16 %v587_v31, %v1424_v55  ;;  %v790_v43 = vpack.c.bf16 %v786_v41, %v587_v31  ;;  %v918_v45 = vld [vmem:[#allocation2 + $0x92] sm:$0xff] }
  0x35   : > { %v657_v34 = vpack.c.bf16 %v653_v32, %v455_v24  ;;  %v719_v38 = vld [vmem:[#allocation2 + $0x82] sm:$0xff]  ;;  %v856_v46 = vpack.c.bf16 %v852_v44, %v653_v32 }
  0x36   : > { %v723_v39 = vpack.c.bf16 %v719_v38, %v521_v29  ;;  %v922_v47 = vpack.c.bf16 %v918_v45, %v719_v38  ;;  %v375_v24 = vld [vmem:[%s1649_s4 + $0x8] sm:$0xff] }
  0x3c   : > { %1170 = vmatmul.msk.bf16.vlgmr.msrb.gmra.mxu2 %vm337_vm1, %v522_v3 }
  0x40   : > { %1175 = vmatmul.msk.bf16.vlgmr.msrb.gmra.mxu3 %vm337_vm1, %v588_v7 }
  0x41   : > { %1180 = vmatmul.msk.bf16.vlgmr.msrb.gmra.mxu0 %vm337_vm1, %v654_v8 }
  0x42   : > { %1166 = vmatmul.msk.bf16.gmra.mxu1 %vm337_vm1, %v457_v9 }
  0x4c   : > { %1171 = vmatmul.msk.bf16.gmra.mxu2 %vm337_vm1, %v523_v16 }
  0x50   : > { %1176 = vmatmul.msk.bf16.gmra.mxu3 %vm337_vm1, %v589_v19 }
  0x51   : > { %1181 = vmatmul.msk.bf16.gmra.mxu0 %vm337_vm1, %v655_v20 }
  0x52   : > { %1167 = vmatmul.msk.bf16.gmra.mxu1 %vm337_vm1, %v458_v2 }
  0x5c   : > { %1172 = vmatmul.msk.bf16.gmra.mxu2 %vm337_vm1, %v524_v22 }
  0x60   : > { %1177 = vmatmul.msk.bf16.gmra.mxu3 %vm337_vm1, %v590_v25 }
  0x61   : > { %1182 = vmatmul.msk.bf16.gmra.mxu0 %vm337_vm1, %v656_v26 }
  0x62   : > { %1168 = vmatmul.msk.bf16.gmra.mxu1 %vm337_vm1, %v459_v27 }
  0x6c   : > { %1173 = vmatmul.msk.bf16.gmra.mxu2 %vm337_vm1, %v525_v30 }
  0x70   : > { %1178 = vmatmul.msk.bf16.gmra.mxu3 %vm337_vm1, %v591_v33 }
  0x71   : > { %1183 = vmatmul.msk.bf16.gmra.mxu0 %vm337_vm1, %v657_v34  ;;  %v376_v34 = vld [vmem:[%s1649_s4 + $0x10] sm:$0xff] }
  0x72   : > { %1185 = vmatmul.msk.bf16.vlgmr.msra.gmra.mxu1 %vm337_vm1, %v720_v35 }
  0x7c   : > { %1190 = vmatmul.msk.bf16.vlgmr.msra.gmra.mxu2 %vm337_vm1, %v1382_v40 }
  0x80   : > { %1195 = vmatmul.msk.bf16.vlgmr.msra.gmra.mxu3 %vm337_vm1, %v457_v9 }
  0x81   : > { %1200 = vmatmul.msk.bf16.vlgmr.msra.gmra.mxu0 %vm337_vm1, %v523_v16 }
  0x82   : > { %1186 = vmatmul.msk.bf16.gmra.mxu1 %vm337_vm1, %v721_v36 }
  0x8c   : > { %1191 = vmatmul.msk.bf16.gmra.mxu2 %vm337_vm1, %v1409_v49 }
  0x90   : > { %1196 = vmatmul.msk.bf16.gmra.mxu3 %vm337_vm1, %v458_v2 }
  0x91   : > { %1201 = vmatmul.msk.bf16.gmra.mxu0 %vm337_vm1, %v524_v22 }
  0x92   : > { %1187 = vmatmul.msk.bf16.gmra.mxu1 %vm337_vm1, %v722_v37 }
  0x9c   : > { %1192 = vmatmul.msk.bf16.gmra.mxu2 %vm337_vm1, %v1427_v56 }
  0x9f   : > { %v1471_v40 = vpop.f32.mrf.mxu1 }
  0xa0   : > { %1197 = vmatmul.msk.bf16.gmra.mxu3 %vm337_vm1, %v459_v27  ;;  %v442_v38 = vadd.f32 %v1471_v40, %v376_v34 }
  0xa1   : > { %1202 = vmatmul.msk.bf16.gmra.mxu0 %vm337_vm1, %v525_v30 }
  0xa2   : > { %1188 = vmatmul.msk.bf16.gmra.mxu1 %vm337_vm1, %v723_v39 }
  0xa7   : > { %v1476_v42 = vpop.f32.mrf.mxu1 }
  0xac   : > { %1193 = vmatmul.msk.bf16.gmra.mxu2 %vm337_vm1, %v790_v43 }
  0xae   : > { %v420_v48 = vpop.f32.mrf.mxu0 }
  0xaf   : > { %v1479_v49 = vpop.f32.mrf.mxu2  ;;  %v486_v50 = vpop.f32.mrf.mxu1  ;;  %v440_v4 = vadd.f32 %v420_v48, %v374_v18 }
  0xb0   : > { %1198 = vmatmul.msk.bf16.gmra.mxu3 %vm337_vm1, %v856_v46 }
  0xb1   : > { %1203 = vmatmul.msk.bf16.gmra.mxu0 %vm337_vm1, %v922_v47  ;;  %v506_v21 = vadd.f32 %v486_v50, %v440_v4  ;;  %v377_v50 = vld [vmem:[%s1649_s4 + $0x18] sm:$0xff] }
  0xb3   : > { %v1483_v51 = vpop.f32.mrf.mxu3 }
  0xb6   : > { %v422_v52 = vpop.f32.mrf.mxu0 }
  0xb7   : > { %v1485_v53 = vpop.f32.mrf.mxu2  ;;  %v488_v54 = vpop.f32.mrf.mxu1  ;;  %v441_v28 = vadd.f32 %v422_v52, %v375_v24 }
  0xb9   : > { %v507_v30 = vadd.f32 %v488_v54, %v441_v28 }
  0xbb   : > { %v1487_v55 = vpop.f32.mrf.mxu3 }
  0xbe   : > { %v684_v56 = vpop.f32.mrf.mxu0 }
  0xbf   : > { %v552_v57 = vpop.f32.mrf.mxu2  ;;  %v491_v58 = vpop.f32.mrf.mxu1 }
  0xc0   : > { %v572_v23 = vadd.f32 %v552_v57, %v506_v21  ;;  %v508_v44 = vadd.f32 %v491_v58, %v442_v38  ;;  %v443_v57 = vadd.f32 %v1476_v42, %v377_v50 }
  0xc3   : > { %v618_v59 = vpop.f32.mrf.mxu3 }
  0xc4   : > { %v638_v29 = vadd.f32 %v618_v59, %v572_v23 }
  0xc6   : > { %v686_v60 = vpop.f32.mrf.mxu0  ;;  %v704_v33 = vadd.f32 %v684_v56, %v638_v29 }
  0xc7   : > { %v554_v61 = vpop.f32.mrf.mxu2  ;;  %v493_v62 = vpop.f32.mrf.mxu1 }
  0xc8   : > { %v573_v32 = vadd.f32 %v554_v61, %v507_v30 }
  0xcb   : > { %v620_v63 = vpop.f32.mrf.mxu3 }
  0xcc   : > { %v639_v39 = vadd.f32 %v620_v63, %v573_v32 }
  0xce   : > { %v1489_v0 = vpop.f32.mrf.mxu0  ;;  %v705_v48 = vadd.f32 %v686_v60, %v639_v39  ;;  %v509_v60 = vadd.f32 %v493_v62, %v443_v57 }
  0xcf   : > { %v557_v1 = vpop.f32.mrf.mxu2  ;;  %v1491_v3 = vpop.f32.mrf.mxu1 }
  0xd0   : > { %v574_v46 = vadd.f32 %v557_v1, %v508_v44  ;;  %v378_v1 = vld [vmem:[%s1649_s4 + $0x20] sm:$0xff] }
  0xd1   : > { %v444_v23 = vadd.f32 %v1479_v49, %v378_v1  ;;  %v379_v49 = vld [vmem:[%s1649_s4 + $0x28] sm:$0xff] }
  0xd3   : > { %v623_v5 = vpop.f32.mrf.mxu3  ;;  %v510_v28 = vadd.f32 %v1491_v3, %v444_v23  ;;  %v445_v3 = vadd.f32 %v1485_v53, %v379_v49 }
  0xd4   : > { %v640_v58 = vadd.f32 %v623_v5, %v574_v46 }
  0xd6   : > { %v1493_v6 = vpop.f32.mrf.mxu0  ;;  %v706_v4 = vadd.f32 %v1489_v0, %v640_v58 }
  0xd7   : > { %v559_v7 = vpop.f32.mrf.mxu2  ;;  %v1495_v8 = vpop.f32.mrf.mxu1 }
  0xd8   : > { %v575_v18 = vadd.f32 %v559_v7, %v509_v60 }
  0xdb   : > { %v625_v9 = vpop.f32.mrf.mxu3 }
  0xde   : > { %v1497_v10 = vpop.f32.mrf.mxu0 }
  0xdf   : > { %v1499_v11 = vpop.f32.mrf.mxu2  ;;  %v1501_v12 = vpop.f32.mrf.mxu1 }
  0xe0   : > { %v576_v7 = vadd.f32 %v1499_v11, %v510_v28 }
  0xe3   : > { %v1503_v13 = vpop.f32.mrf.mxu3 }
  0xe6   : > { %v1505_v14 = vpop.f32.mrf.mxu0 }
  0xe7   : > { %v1507_v15 = vpop.f32.mrf.mxu2  ;;  %v1509_v16 = vpop.f32.mrf.mxu1 }
  0xeb   : > { %v1511_v17 = vpop.f32.mrf.mxu3 }
  0xee   : > { %v1516_v19 = vpop.f32.mrf.mxu0 }
  0xef   : > { %v1518_v20 = vpop.f32.mrf.mxu2  ;;  %v750_v2 = vpop.f32.mrf.mxu1 }
  0xf0   : > { %v770_v35 = vadd.f32 %v750_v2, %v704_v33 }
  0xf3   : > { %v1520_v22 = vpop.f32.mrf.mxu3 }
  0xf6   : > { %v1525_v25 = vpop.f32.mrf.mxu0 }
  0xf7   : > { %v1527_v26 = vpop.f32.mrf.mxu2  ;;  %v752_v27 = vpop.f32.mrf.mxu1 }
  0xf8   : > { %v771_v52 = vadd.f32 %v752_v27, %v705_v48  ;;  %v641_v27 = vadd.f32 %v625_v9, %v575_v18 }
  0xfa   : > { %v707_v0 = vadd.f32 %v1493_v6, %v641_v27  ;;  %v511_v6 = vadd.f32 %v1495_v8, %v445_v3  ;;  %v380_v8 = vld [vmem:[%s1649_s4 + $0x30] sm:$0xff] }
  0xfb   : > { %v1529_v31 = vpop.f32.mrf.mxu3 }
  0xfe   : > { %v949_v36 = vpop.f32.mrf.mxu0 }
  0xff   : > { %v817_v37 = vpop.f32.mrf.mxu2  ;;  %v755_v43 = vpop.f32.mrf.mxu1 }
 0x100   : > { %v837_v41 = vadd.f32 %v817_v37, %v770_v35  ;;  %v772_v42 = vadd.f32 %v755_v43, %v706_v4  ;;  %v642_v35 = vadd.f32 %v1503_v13, %v576_v7 }
 0x102   : > { %v708_v39 = vadd.f32 %v1497_v10, %v642_v35 }
 0x103   : > { %v883_v45 = vpop.f32.mrf.mxu3 }
 0x104   : > { %v903_v47 = vadd.f32 %v883_v45, %v837_v41  ;;  %v577_v41 = vadd.f32 %v1507_v15, %v511_v6  ;;  %v446_v15 = vadd.f32 %v1483_v51, %v380_v8  ;;  %v381_v51 = vld [vmem:[%s1649_s4 + $0x38] sm:$0xff] }
 0x106   : > { %v1545_v40 = vadd.f32 %v949_v36, %v903_v47  ;;  %v951_v54 = vpop.f32.mrf.mxu0  ;;  %v512_v58 = vadd.f32 %v1501_v12, %v446_v15 }
 0x107   : > { %v819_v56 = vpop.f32.mrf.mxu2  ;;  %v757_v61 = vpop.f32.mrf.mxu1 }
 0x108   : > { %977 = vst.msk [vmem:[%s1543_s19] sm:$0xff] %vm337_vm1, %v1545_v40  ;;  %v838_v59 = vadd.f32 %v819_v56, %v771_v52  ;;  %v773_v9 = vadd.f32 %v757_v61, %v707_v0  ;;  %v985_v13 = vsel %vm337_vm1, %v1545_v40, 0.0  ;;  %v643_v52 = vadd.f32 %v1511_v17, %v577_v41 }
 0x109   : > { %v578_v60 = vadd.f32 %v1518_v20, %v512_v58 }
 0x10b   : > { %v885_v63 = vpop.f32.mrf.mxu3  ;;  %v644_v4 = vadd.f32 %v1520_v22, %v578_v60 }
 0x10c   : > { %v904_v2 = vadd.f32 %v885_v63, %v838_v59  ;;  %v709_v63 = vadd.f32 %v1505_v14, %v643_v52 }
 0x10d   : > { %v710_v28 = vadd.f32 %v1516_v19, %v644_v4 }
 0x10e   : > { %v1555_v21 = vadd.f32 %v951_v54, %v904_v2  ;;  %v954_v5 = vpop.f32.mrf.mxu0  ;;  %v447_v2 = vadd.f32 %v1487_v55, %v381_v51 }
 0x10f   : > { %v822_v24 = vpop.f32.mrf.mxu2  ;;  %v760_v32 = vpop.f32.mrf.mxu1 }
 0x110   : > { %978 = vst.msk [vmem:[%s1543_s19 + $0x8] sm:$0xff] %vm337_vm1, %v1555_v21  ;;  %v839_v62 = vadd.f32 %v822_v24, %v772_v42  ;;  %v986_v37 = vsel %vm337_vm1, %v1555_v21, 0.0  ;;  %v774_v46 = vadd.f32 %v760_v32, %v708_v39  ;;  %v513_v23 = vadd.f32 %v1509_v16, %v447_v2 }
 0x111   : > { %v987_v44 = vadd.f32 %v986_v37, %v985_v13 }
 0x112   : > { %v579_v27 = vadd.f32 %v1527_v26, %v513_v23 }
 0x113   : > { %v888_v29 = vpop.f32.mrf.mxu3 }
 0x114   : > { %v905_v30 = vadd.f32 %v888_v29, %v839_v62  ;;  %v645_v29 = vadd.f32 %v1529_v31, %v579_v27 }
 0x116   : > { %v1567_v33 = vadd.f32 %v954_v5, %v905_v30  ;;  %v956_v34 = vpop.f32.mrf.mxu0 }
 0x117   : > { %v824_v36 = vpop.f32.mrf.mxu2  ;;  %v762_v47 = vpop.f32.mrf.mxu1 }
 0x118   : > { %979 = vst.msk [vmem:[%s1543_s19 + $0x10] sm:$0xff] %vm337_vm1, %v1567_v33  ;;  %v840_v11 = vadd.f32 %v824_v36, %v773_v9  ;;  %v988_v53 = vsel %vm337_vm1, %v1567_v33, 0.0  ;;  %v775_v1 = vadd.f32 %v762_v47, %v709_v63 }
 0x119   : > { %v989_v48 = vadd.f32 %v988_v53, %v987_v44 }
 0x11b   : > { %v890_v38 = vpop.f32.mrf.mxu3 }
 0x11c   : > { %v906_v43 = vadd.f32 %v890_v38, %v840_v11 }
 0x11e   : > { %v1586_v45 = vadd.f32 %v956_v34, %v906_v43  ;;  %v959_v10 = vpop.f32.mrf.mxu0  ;;  %v711_v34 = vadd.f32 %v1525_v25, %v645_v29 }
 0x11f   : > { %v827_v50 = vpop.f32.mrf.mxu2  ;;  %v765_v42 = vpop.f32.mrf.mxu1 }
 0x120   : > { %980 = vst.msk [vmem:[%s1543_s19 + $0x18] sm:$0xff] %vm337_vm1, %v1586_v45  ;;  %v990_v54 = vsel %vm337_vm1, %v1586_v45, 0.0  ;;  %v841_v56 = vadd.f32 %v827_v50, %v774_v46  ;;  %v776_v22 = vadd.f32 %v765_v42, %v710_v28 }
 0x121   : > { %v991_v57 = vadd.f32 %v990_v54, %v989_v48 }
 0x123   : > { %v893_v59 = vpop.f32.mrf.mxu3 }
 0x124   : > { %v907_v61 = vadd.f32 %v893_v59, %v841_v56 }
 0x126   : > { %v973_v17 = vadd.f32 %v959_v10, %v907_v61  ;;  %v961_v14 = vpop.f32.mrf.mxu0 }
 0x127   : > { %v829_v18 = vpop.f32.mrf.mxu2  ;;  %v767_v49 = vpop.f32.mrf.mxu1 }
 0x128   : > { %981 = vst.msk [vmem:[%s1543_s19 + $0x20] sm:$0xff] %vm337_vm1, %v973_v17  ;;  %v992_v12 = vsel %vm337_vm1, %v973_v17, 0.0  ;;  %v842_v20 = vadd.f32 %v829_v18, %v775_v1  ;;  %v777_v35 = vadd.f32 %v767_v49, %v711_v34 }
 0x129   : > { %v993_v5 = vadd.f32 %v992_v12, %v991_v57 }
 0x12b   : > { %v895_v24 = vpop.f32.mrf.mxu3 }
 0x12c   : > { %v908_v62 = vadd.f32 %v895_v24, %v842_v20 }
 0x12e   : > { %v974_v55 = vadd.f32 %v961_v14, %v908_v62  ;;  %v964_v16 = vpop.f32.mrf.mxu0 }
 0x12f   : > { %v832_v7 = vpop.f32.mrf.mxu2 }
 0x130   : > { %982 = vst.msk [vmem:[%s1543_s19 + $0x28] sm:$0xff] %vm337_vm1, %v974_v55  ;;  %v994_v30 = vsel %vm337_vm1, %v974_v55, 0.0  ;;  %v843_v0 = vadd.f32 %v832_v7, %v776_v22 }
 0x131   : > { %v995_v32 = vadd.f32 %v994_v30, %v993_v5 }
 0x133   : > { %v898_v9 = vpop.f32.mrf.mxu3 }
 0x134   : > { %v909_v26 = vadd.f32 %v898_v9, %v843_v0 }
 0x136   : > { %v975_v19 = vadd.f32 %v964_v16, %v909_v26  ;;  %v966_v38 = vpop.f32.mrf.mxu0 }
 0x137   : > { %v834_v36 = vpop.f32.mrf.mxu2 }
 0x138   : > { %983 = vst.msk [vmem:[%s1543_s19 + $0x30] sm:$0xff] %vm337_vm1, %v975_v19  ;;  %v996_v31 = vsel %vm337_vm1, %v975_v19, 0.0  ;;  %v844_v3 = vadd.f32 %v834_v36, %v777_v35 }
 0x139   : > { %v997_v11 = vadd.f32 %v996_v31, %v995_v32 }
 0x13b   : > { %v900_v6 = vpop.f32.mrf.mxu3 }
 0x13c   : > { %v910_v37 = vadd.f32 %v900_v6, %v844_v3 }
 0x13e   : > { %v976_v39 = vadd.f32 %v966_v38, %v910_v37 }
 0x140   : > { %984 = vst.msk [vmem:[%s1543_s19 + $0x38] sm:$0xff] %vm337_vm1, %v976_v39  ;;  %v998_v41 = vsel %vm337_vm1, %v976_v39, 0.0 }
 0x141   : > { %v999_v13 = vadd.f32 %v998_v41, %v997_v11 }
 0x143   : > { %v1000_v25 = vrot.slane %v999_v13, 4 }
 0x145   : > { %v1001_v53 = vadd.f32 %v1000_v25, %v999_v13 }
 0x147   : > { %v1002_v43 = vrot.slane %v1001_v53, 2 }
 0x149   : > { %v1003_v8 = vadd.f32 %v1002_v43, %v1001_v53 }
 0x14b   : > { %v1004_v44 = vrot.slane %v1003_v8, 1 }
 0x14d   : > { %v1005_v46 = vadd.f32 %v1004_v44, %v1003_v8 }
 0x14f   : > { %v1006_v47 = vmul.f32 0.015625, %v1005_v46  ;;  %1015 = vst.msk [vmem:[%s292_s9] sm:$0x1] %vm344_vm2, %v1005_v46 }
 0x151   : > { %v1007_v48 = vsub.f32 %v1545_v40, %v1006_v47  ;;  %v1008_v10 = vsub.f32 %v1555_v21, %v1006_v47  ;;  %v1009_v50 = vsub.f32 %v1567_v33, %v1006_v47  ;;  %v1010_v15 = vsub.f32 %v1586_v45, %v1006_v47 }
 0x152   : > { %v1011_v52 = vsub.f32 %v973_v17, %v1006_v47  ;;  %v1012_v54 = vsub.f32 %v974_v55, %v1006_v47  ;;  %v1013_v56 = vsub.f32 %v975_v19, %v1006_v47  ;;  %v1014_v57 = vsub.f32 %v976_v39, %v1006_v47 }
 0x153   : > { %v1016_v58 = vmul.f32 %v1007_v48, %v1007_v48  ;;  %v1017_v59 = vmul.f32 %v1008_v10, %v1008_v10  ;;  %v1018_v60 = vmul.f32 %v1009_v50, %v1009_v50  ;;  %v1019_v61 = vmul.f32 %v1010_v15, %v1010_v15 }
 0x154   : > { %v1020_v40 = vmul.f32 %v1011_v52, %v1011_v52  ;;  %v1021_v33 = vmul.f32 %v1012_v54, %v1012_v54  ;;  %v1022_v2 = vmul.f32 %v1013_v56, %v1013_v56  ;;  %v1023_v20 = vmul.f32 %v1014_v57, %v1014_v57 }
 0x155   : > { %v1024_v63 = vsel %vm337_vm1, %v1016_v58, 0.0  ;;  %v1025_v51 = vsel %vm337_vm1, %v1017_v59, 0.0  ;;  %v1027_v21 = vsel %vm337_vm1, %v1018_v60, 0.0  ;;  %v1029_v45 = vsel %vm337_vm1, %v1019_v61, 0.0 }
 0x156   : > { %v1026_v1 = vadd.f32 %v1025_v51, %v1024_v63  ;;  %v1031_v4 = vsel %vm337_vm1, %v1020_v40, 0.0  ;;  %v1033_v42 = vsel %vm337_vm1, %v1021_v33, 0.0  ;;  %v1035_v14 = vsel %vm337_vm1, %v1022_v2, 0.0 }
 0x157   : > { %v1037_v24 = vsel %vm337_vm1, %v1023_v20, 0.0 }
 0x158   : > { %v1028_v18 = vadd.f32 %v1027_v21, %v1026_v1 }
 0x15a   : > { %v1030_v17 = vadd.f32 %v1029_v45, %v1028_v18 }
 0x15c   : > { %v1032_v12 = vadd.f32 %v1031_v4, %v1030_v17 }
 0x15e   : > { %v1034_v5 = vadd.f32 %v1033_v42, %v1032_v12 }
 0x160   : > { %v1036_v23 = vadd.f32 %v1035_v14, %v1034_v5 }
 0x162   : > { %v1038_v27 = vadd.f32 %v1037_v24, %v1036_v23 }
 0x164   : > { %v1039_v62 = vrot.slane %v1038_v27, 4 }
 0x166   : > { %v1040_v28 = vadd.f32 %v1039_v62, %v1038_v27 }
 0x168   : > { %v1041_v55 = vrot.slane %v1040_v28, 2 }
 0x16a   : > { %v1042_v22 = vadd.f32 %v1041_v55, %v1040_v28 }
 0x16c   : > { %v1043_v7 = vrot.slane %v1042_v22, 1 }
 0x16e   : > { %v1044_v29 = vadd.f32 %v1043_v7, %v1042_v22 }
 0x170   : > { %1045 = vst.msk [vmem:[%s295_s12] sm:$0x1] %vm344_vm2, %v1044_v29 }
 0x171 PF: > { %s18_s24 = sadd.s32 1, %s1228_s24  }
 0x172   : > { %p15_p4 = scmp.ge.s32.totalorder %s18_s24, 4  }
 0x174   :  { %17 = sbr.rel (!%p15_p4) target bundleno = 1 (0x1), region = 105 }

</bundles_post_ra>
